<compile_context>
chip_gen: v6e
topology: v6e:2x2x1
jax: 0.10.0
libtpu: 0.0.40
codegen_flags: <defaults>
</compile_context>

<pallas_src>
import functools
from typing import Sequence

import jax
import jax.numpy as jnp
from jax.experimental import pallas as pl
from jax.experimental.pallas import tpu as pltpu


def _round_up(x: int, m: int) -> int:
    return ((x + m - 1) // m) * m


# -----------------------------------------------------------------------------
# Kernel
# -----------------------------------------------------------------------------
def _make_kernel(n_shared_layers: int, n_bypass_layers: int):
    """Kernel closure for fixed layer counts.

    Ref order (positional):
      x,                                        # (TILE_B, F) bf16
      [sw_i, sb_i] * n_shared_layers,           # shared trunk (bf16 W, f32 b)
      [bw_i, bb_i] * n_bypass_layers,           # this task-chunk's bypass fold
      ow_shared, ow_bypass, ob,                 # this task-chunk's output fold
      out,                                      # (TILE_B, OUT_PAD) f32
      h_shared_scratch                          # (TILE_B, H_sh) bf16 carry
    """

    def kernel(*refs):
        x_ref = refs[0]
        p = 1
        shared = refs[p:p + 2 * n_shared_layers]
        p += 2 * n_shared_layers
        bypass = refs[p:p + 2 * n_bypass_layers]
        p += 2 * n_bypass_layers
        ow_sh_ref, ow_by_ref, ob_ref, out_ref, h_scr = refs[p:p + 5]

        cdt = x_ref.dtype            # compute dtype (bf16)
        x = x_ref[...]
        chunk = pl.program_id(1)     # task-chunk index (inner, "arbitrary")

        # Shared trunk: compute once per batch tile, carry across task chunks.
        @pl.when(chunk == 0)
        def _compute_shared_trunk():
            h = x
            for i in range(n_shared_layers):
                w = shared[2 * i][...]
                b = shared[2 * i + 1][...]
                h = jnp.dot(h, w, preferred_element_type=jnp.float32) + b
                h = jnp.maximum(h, 0.0).astype(cdt)   # ReLU; Dropout = identity
            h_scr[...] = h

        # Bypass towers for this task chunk (task dim folded into lanes;
        # deeper layers are block-diagonal within the chunk only).
        hb = x
        for i in range(n_bypass_layers):
            w = bypass[2 * i][...]
            b = bypass[2 * i + 1][...]
            hb = jnp.dot(hb, w, preferred_element_type=jnp.float32) + b
            hb = jnp.maximum(hb, 0.0).astype(cdt)

        # Output layer on concat([shared, bypass]) as a split matmul.
        logits = (
            jnp.dot(h_scr[...], ow_sh_ref[...], preferred_element_type=jnp.float32)
            + jnp.dot(hb, ow_by_ref[...], preferred_element_type=jnp.float32)
            + ob_ref[...]
        )
        out_ref[...] = logits.astype(out_ref.dtype)   # lane-dense 128-wide store

    return kernel


# -----------------------------------------------------------------------------
# One-time parameter folding (hoisted out of the forward path)
# -----------------------------------------------------------------------------
def _chunk_block_diag(w):
    """(chunk_t, din, dout) -> block-diagonal (chunk_t*din, chunk_t*dout)."""
    ct, din, dout = w.shape
    eye = jnp.eye(ct, dtype=w.dtype)
    return jnp.einsum("tio,ts->tiso", w, eye).reshape(ct * din, ct * dout)


def fold_params(params, n_tasks, n_classes, *, task_lane_tile=128,
                compute_dtype=jnp.bfloat16):
    """Fold per-task weights into lane-chunked form.  Call ONCE, reuse.

    task_lane_tile=128 is one MXU tile on v5e (and still efficient on
    v6e/v7x); zero-fill inside one tile is free, beyond it is waste.
    """
    T = n_tasks
    C = n_classes

    shared_ws = [jnp.asarray(w, compute_dtype) for w in params["shared_ws"]]
    shared_bs = [jnp.asarray(b, jnp.float32) for b in params["shared_bs"]]
    h_shared = shared_ws[-1].shape[1]

    byp_hidden = [int(w.shape[2]) for w in params["byp_ws"]]
    max_h = max(byp_hidden + [C])
    chunk_t = max(1, min(T, task_lane_tile // max_h))
    n_chunks = -(-T // chunk_t)
    t_pad = n_chunks * chunk_t

    def pad_tasks(a):
        if t_pad == T:
            return a
        return jnp.pad(a, ((0, t_pad - T),) + ((0, 0),) * (a.ndim - 1))

    byp_ws, byp_bs = [], []
    for i, (w, b) in enumerate(zip(params["byp_ws"], params["byp_bs"])):
        w = pad_tasks(jnp.asarray(w, jnp.float32))      # (t_pad, din, dout)
        b = pad_tasks(jnp.asarray(b, jnp.float32))      # (t_pad, 1, dout)
        din, dout = int(w.shape[1]), int(w.shape[2])
        wc = w.reshape(n_chunks, chunk_t, din, dout)
        if i == 0:
            # Plain lane fold per chunk: x @ [W^t0 | W^t1 | ...]
            fw = jnp.transpose(wc, (0, 2, 1, 3)).reshape(n_chunks, din,
                                                         chunk_t * dout)
        else:
            # Block-diagonal only within a chunk (<= task_lane_tile wide).
            fw = jax.vmap(_chunk_block_diag)(wc)
        fb = b.reshape(n_chunks, 1, chunk_t * dout)
        byp_ws.append(fw.astype(compute_dtype))
        byp_bs.append(fb.astype(jnp.float32))

    out_w = chunk_t * C
    out_pad = _round_up(out_w, 128)                     # lane-dense chunk width

    ow_sh = pad_tasks(jnp.asarray(params["ow_shared"], jnp.float32))
    ow_by = pad_tasks(jnp.asarray(params["ow_bypass"], jnp.float32))
    ob = pad_tasks(jnp.asarray(params["ob"], jnp.float32))
    h_sh = int(ow_sh.shape[1])
    h_by = int(ow_by.shape[1])

    f_sh = jnp.transpose(ow_sh.reshape(n_chunks, chunk_t, h_sh, C),
                         (0, 2, 1, 3)).reshape(n_chunks, h_sh, out_w)
    f_by = jax.vmap(_chunk_block_diag)(ow_by.reshape(n_chunks, chunk_t, h_by, C))
    f_ob = ob.reshape(n_chunks, 1, out_w)

    lane_pad = out_pad - out_w
    if lane_pad:
        f_sh = jnp.pad(f_sh, ((0, 0), (0, 0), (0, lane_pad)))
        f_by = jnp.pad(f_by, ((0, 0), (0, 0), (0, lane_pad)))
        f_ob = jnp.pad(f_ob, ((0, 0), (0, 0), (0, lane_pad)))

    return {
        "shared_ws": shared_ws, "shared_bs": shared_bs,
        "byp_ws": byp_ws, "byp_bs": byp_bs,
        "ow_sh": f_sh.astype(compute_dtype),
        "ow_by": f_by.astype(compute_dtype),
        "ob": f_ob.astype(jnp.float32),
        "chunk_t": chunk_t, "n_chunks": n_chunks, "t_pad": t_pad,
        "out_pad": out_pad, "n_tasks": T, "n_classes": C,
        "h_shared": h_shared, "compute_dtype": compute_dtype,
    }


# -----------------------------------------------------------------------------
# Forward wrapper (takes PRE-FOLDED params)
# -----------------------------------------------------------------------------
def robust_multitask_forward(x, folded, *, mode="classification", tile_b=None):
    B, F = x.shape
    cdt = folded["compute_dtype"]
    n_tasks, C = folded["n_tasks"], folded["n_classes"]
    n_chunks, chunk_t = folded["n_chunks"], folded["chunk_t"]
    t_pad, out_pad, h_sh = folded["t_pad"], folded["out_pad"], folded["h_shared"]
    n_shared = len(folded["shared_ws"])
    n_bypass = len(folded["byp_ws"])

    # Batch tiling: multiple of 16 (bf16 sublane packing).  Production
    # throughput configs should push this to 256-512 (VMEM permitting).
    if tile_b is None:
        tile_b = min(256, _round_up(B, 16))
    tile_b = max(16, _round_up(tile_b, 16))
    b_pad = _round_up(B, tile_b)
    nb = b_pad // tile_b

    xb = x.astype(cdt)
    if b_pad > B:
        xb = jnp.pad(xb, ((0, b_pad - B), (0, 0)))

    inputs = [xb]
    for w, b in zip(folded["shared_ws"], folded["shared_bs"]):
        inputs += [w, b]
    for w, b in zip(folded["byp_ws"], folded["byp_bs"]):
        inputs += [w, b]
    inputs += [folded["ow_sh"], folded["ow_by"], folded["ob"]]

    # Rough VMEM budget: weights (conservatively x2) + pipelined activations.
    est = 2 * tile_b * F * 2 + 2 * tile_b * out_pad * 4 + tile_b * h_sh * 2
    for w, b in zip(folded["shared_ws"], folded["shared_bs"]):
        est += 2 * (w.size * w.dtype.itemsize + b.size * b.dtype.itemsize)
    for a in (list(folded["byp_ws"]) + list(folded["byp_bs"])
              + [folded["ow_sh"], folded["ow_by"], folded["ob"]]):
        est += 2 * (a.size // a.shape[0]) * a.dtype.itemsize
    # Cap with headroom below v7x's 64 MiB physical VMEM; re-derive tile_b for
    # configs whose working set does not fit this budget.
    vmem_limit = int(min(48 * 2**20, max(32 * 2**20, 2 * est)))

    kernel = _make_kernel(n_shared, n_bypass)

    def _run(single_buffer_weights: bool):
        def _resident_spec(shape, single):
            idx = lambda i, j: (0,) * len(shape)
            if single:
                return pl.BlockSpec(shape, idx, pipeline_mode=pl.Buffered(1))
            return pl.BlockSpec(shape, idx)

        def _chunk_spec(shape, single):
            bs = (None,) + tuple(shape[1:])      # squeeze the chunk axis
            idx = lambda i, j: (j, 0, 0)
            if single:
                return pl.BlockSpec(bs, idx, pipeline_mode=pl.Buffered(1))
            return pl.BlockSpec(bs, idx)

        # Single-buffer weights whose block index never changes; keep default
        # double-buffering for streamed (multi-chunk) weights and x / out.
        chunk_single = single_buffer_weights and n_chunks == 1

        in_specs = [pl.BlockSpec((tile_b, F), lambda i, j: (i, 0))]
        for w, b in zip(folded["shared_ws"], folded["shared_bs"]):
            in_specs.append(_resident_spec(w.shape, single_buffer_weights))
            in_specs.append(_resident_spec(b.shape, single_buffer_weights))
        for w, b in zip(folded["byp_ws"], folded["byp_bs"]):
            in_specs.append(_chunk_spec(w.shape, chunk_single))
            in_specs.append(_chunk_spec(b.shape, chunk_single))
        for a in (folded["ow_sh"], folded["ow_by"], folded["ob"]):
            in_specs.append(_chunk_spec(a.shape, chunk_single))

        out_spec = pl.BlockSpec((tile_b, out_pad), lambda i, j: (i, j))

        return pl.pallas_call(
            kernel,
            out_shape=jax.ShapeDtypeStruct((b_pad, n_chunks * out_pad),
                                           jnp.float32),
            grid_spec=pltpu.PrefetchScalarGridSpec(
                num_scalar_prefetch=0,
                grid=(nb, n_chunks),
                in_specs=in_specs,
                out_specs=out_spec,
                scratch_shapes=[pltpu.VMEM((tile_b, h_sh), cdt)],
            ),
            compiler_params=pltpu.CompilerParams(
                dimension_semantics=("parallel", "arbitrary"),
                vmem_limit_bytes=vmem_limit,
            ),
        )(*inputs)

    try:
        out_flat = _run(single_buffer_weights=True)
    except Exception:
        # pl.Buffered(1) single-buffering is not supported on every jax/Mosaic
        # version; fall back to default double-buffered weight specs.
        out_flat = _run(single_buffer_weights=False)

    # Un-pad: drop batch padding, drop the per-chunk lane padding, drop task
    # padding.  Columns are task-major within each chunk.
    out = out_flat[:B].reshape(B, n_chunks, out_pad)[:, :, :chunk_t * C]
    output = out.reshape(B, t_pad, C)[:, :n_tasks, :]       # (B, T, C)

    if mode == "classification":
        if n_tasks == 1:
            logits = output.reshape(-1, C)
            proba = jax.nn.softmax(logits, axis=1)
        else:
            logits = output.reshape(-1, n_tasks, C)
            proba = jax.nn.softmax(logits, axis=2)
        return proba, logits
    # Regression: matches torch's output.squeeze(-2) (no-op unless n_tasks==1).
    return jnp.squeeze(output, axis=-2) if n_tasks == 1 else output


# -----------------------------------------------------------------------------
# Deterministic parameter construction (mirrors RobustMultitask.__init__)
# -----------------------------------------------------------------------------
def init_params(key, n_features, layer_sizes: Sequence[int],
                bypass_layer_sizes: Sequence[int], n_tasks: int,
                n_classes: int, weight_init_stddev=0.02, bias_init_const=1.0):
    def trunc_normal(k, shape, std):
        return (jax.random.truncated_normal(k, -2.0, 2.0, shape, jnp.float32)
                * std)

    keys = jax.random.split(key, 64)
    ki = iter(range(64))

    shared_ws, shared_bs = [], []
    prev = n_features
    for size in layer_sizes:
        shared_ws.append(trunc_normal(keys[next(ki)], (prev, size),
                                      weight_init_stddev))
        shared_bs.append(jnp.full((1, size), bias_init_const, jnp.float32))
        prev = size

    byp_ws, byp_bs = [], []
    prev = n_features
    for size in bypass_layer_sizes:
        byp_ws.append(trunc_normal(keys[next(ki)], (n_tasks, prev, size),
                                   weight_init_stddev))
        byp_bs.append(jnp.full((n_tasks, 1, size), bias_init_const, jnp.float32))
        prev = size

    h_shared = layer_sizes[-1]
    h_bypass = bypass_layer_sizes[-1]
    ow = (jax.random.uniform(keys[next(ki)],
                             (n_tasks, h_shared + h_bypass, n_classes),
                             jnp.float32, -1.0, 1.0)
          / jnp.sqrt(jnp.float32(h_shared + h_bypass)))
    ob = (jax.random.uniform(keys[next(ki)], (n_tasks, 1, n_classes),
                             jnp.float32, -1.0, 1.0)
          / jnp.sqrt(jnp.float32(h_shared + h_bypass)))

    return {
        "shared_ws": shared_ws,
        "shared_bs": shared_bs,
        "byp_ws": byp_ws,
        "byp_bs": byp_bs,
        "ow_shared": ow[:, :h_shared, :],
        "ow_bypass": ow[:, h_shared:, :],
        "ob": ob,
    }


# Plain-JAX reference (per-task loop, like the torch module).  compute_dtype
# lets us build both a bf16-matched reference (tight check) and the f32
# module-semantics reference (loose check).
def reference_forward(x, params, *, mode, n_tasks, n_classes,
                      compute_dtype=jnp.float32):
    cdt = compute_dtype
    xc = x.astype(cdt)
    h = xc
    for w, b in zip(params["shared_ws"], params["shared_bs"]):
        h = (jnp.dot(h, w.astype(cdt), preferred_element_type=jnp.float32)
             + b.astype(jnp.float32))
        h = jnp.maximum(h, 0.0).astype(cdt)
    outs = []
    for t in range(n_tasks):
        hb = xc
        for w, b in zip(params["byp_ws"], params["byp_bs"]):
            hb = (jnp.dot(hb, w[t].astype(cdt),
                          preferred_element_type=jnp.float32)
                  + b[t].astype(jnp.float32))
            hb = jnp.maximum(hb, 0.0).astype(cdt)
        logit_t = (jnp.dot(h, params["ow_shared"][t].astype(cdt),
                           preferred_element_type=jnp.float32)
                   + jnp.dot(hb, params["ow_bypass"][t].astype(cdt),
                             preferred_element_type=jnp.float32)
                   + params["ob"][t].astype(jnp.float32))
        outs.append(logit_t)
    output = jnp.stack(outs, axis=1)
    if mode == "classification":
        if n_tasks == 1:
            logits = output.reshape(-1, n_classes)
            return jax.nn.softmax(logits, axis=1), logits
        logits = output.reshape(-1, n_tasks, n_classes)
        return jax.nn.softmax(logits, axis=2), logits
    return jnp.squeeze(output, axis=-2) if n_tasks == 1 else output


if __name__ == "__main__":
    # Small shapes, chosen so the grid has multiple batch tiles (nb=3) AND
    # multiple task chunks (n_chunks=2) to exercise the trunk carry.
    B = 40
    n_features = 32
    layer_sizes = [64]
    bypass_layer_sizes = [32]
    n_tasks = 6
    n_classes = 2
    mode = "classification"

    key = jax.random.PRNGKey(0)
    kx, kp = jax.random.split(key)
    x = jax.random.normal(kx, (B, n_features), jnp.float32)
    params = init_params(kp, n_features, layer_sizes, bypass_layer_sizes,
                         n_tasks, n_classes)

    # Fold ONCE (hoisted out of the forward path), then reuse.
    folded = fold_params(params, n_tasks, n_classes)

    fwd = functools.partial(robust_multitask_forward, folded=folded,
                            mode=mode, tile_b=16)
    proba, logits = jax.block_until_ready(fwd(x))

    assert proba.shape == (B, n_tasks, n_classes)
    assert logits.shape == (B, n_tasks, n_classes)

    # Tight check vs. a bf16-matched reference (same cast points, f32 accum).
    ref_p16, ref_l16 = reference_forward(x, params, mode=mode,
                                         n_tasks=n_tasks, n_classes=n_classes,
                                         compute_dtype=jnp.bfloat16)
    assert jnp.allclose(logits, ref_l16, atol=1e-4, rtol=1e-4)
    assert jnp.allclose(proba, ref_p16, atol=1e-4, rtol=1e-4)

    # Loose check vs. full-f32 module semantics (bf16 roundoff only).
    ref_p32, ref_l32 = reference_forward(x, params, mode=mode,
                                         n_tasks=n_tasks, n_classes=n_classes,
                                         compute_dtype=jnp.float32)
    assert jnp.allclose(logits, ref_l32, atol=5e-2, rtol=5e-2)
    assert jnp.allclose(proba, ref_p32, atol=5e-2, rtol=5e-2)

    print("KERNEL_OK")
</pallas_src>

<mosaic_0001>
module attributes {stable_mosaic.version = 11 : i64} {
  func.func @kernel(%arg0: i32, %arg1: i32, %arg2: memref<16x32xbf16, #tpu.memory_space<vmem>>, %arg3: memref<32x64xbf16, #tpu.memory_space<vmem>>, %arg4: memref<1x64xf32, #tpu.memory_space<vmem>>, %arg5: memref<1x32x128xbf16, #tpu.memory_space<vmem>>, %arg6: memref<1x1x128xf32, #tpu.memory_space<vmem>>, %arg7: memref<1x64x128xbf16, #tpu.memory_space<vmem>>, %arg8: memref<1x128x128xbf16, #tpu.memory_space<vmem>>, %arg9: memref<1x1x128xf32, #tpu.memory_space<vmem>>, %arg10: memref<16x128xf32, #tpu.memory_space<vmem>>, %arg11: memref<16x64xbf16, #tpu.memory_space<vmem>>) attributes {dimension_semantics = [#tpu.dimension_semantics<parallel>, #tpu.dimension_semantics<arbitrary>], iteration_bounds = array<i64: 3, 2>, scalar_prefetch = 0 : i64, scratch_operands = 1 : i64, tpu.core_type = #tpu.core_type<tc>, window_params = [{transform_indices = @transform_0, window_bounds = array<i64: 16, 32>}, {pipeline_mode = #tpu.pipeline_mode<synchronous>, transform_indices = @transform_1, window_bounds = array<i64: 32, 64>}, {pipeline_mode = #tpu.pipeline_mode<synchronous>, transform_indices = @transform_2, window_bounds = array<i64: 1, 64>}, {transform_indices = @transform_3, window_bounds = array<i64: 1, 32, 128>}, {transform_indices = @transform_4, window_bounds = array<i64: 1, 1, 128>}, {transform_indices = @transform_5, window_bounds = array<i64: 1, 64, 128>}, {transform_indices = @transform_6, window_bounds = array<i64: 1, 128, 128>}, {transform_indices = @transform_7, window_bounds = array<i64: 1, 1, 128>}, {transform_indices = @transform_8, window_bounds = array<i64: 16, 128>}]} {
    %c0 = arith.constant 0 : index
    %c0_0 = arith.constant 0 : index
    %0 = vector.load %arg2[%c0, %c0_0] : memref<16x32xbf16, #tpu.memory_space<vmem>>, vector<16x32xbf16>
    %c0_i32 = arith.constant 0 : i32
    %1 = arith.cmpi eq, %arg1, %c0_i32 : i32
    %2 = arith.extui %1 : i1 to i32
    %c0_i32_1 = arith.constant 0 : i32
    %3 = arith.cmpi ne, %2, %c0_i32_1 : i32
    scf.if %3 {
      %c0_24 = arith.constant 0 : index
      %c0_25 = arith.constant 0 : index
      %27 = vector.load %arg3[%c0_24, %c0_25] : memref<32x64xbf16, #tpu.memory_space<vmem>>, vector<32x64xbf16>
      %c0_26 = arith.constant 0 : index
      %c0_27 = arith.constant 0 : index
      %28 = vector.load %arg4[%c0_26, %c0_27] : memref<1x64xf32, #tpu.memory_space<vmem>>, vector<1x64xf32>
      %cst_28 = arith.constant dense<0.000000e+00> : vector<16x64xf32>
      %29 = tpu.matmul %0, %27, %cst_28 {dimension_numbers = #tpu.dot_dimension_numbers<[1], [0], [0], [1], [0, 0, 1, 1], [], []>} : vector<16x32xbf16>, vector<32x64xbf16>, vector<16x64xf32> -> vector<16x64xf32>
      %30 = vector.broadcast %28 : vector<1x64xf32> to vector<16x64xf32>
      %31 = arith.addf %29, %30 : vector<16x64xf32>
      %cst_29 = arith.constant 0.000000e+00 : f32
      %32 = vector.broadcast %cst_29 : f32 to vector<16x64xf32>
      %33 = arith.maximumf %31, %32 : vector<16x64xf32>
      %34 = arith.truncf %33 : vector<16x64xf32> to vector<16x64xbf16>
      %c0_30 = arith.constant 0 : index
      %c0_31 = arith.constant 0 : index
      %35 = vector.load %arg11[%c0_30, %c0_31] : memref<16x64xbf16, #tpu.memory_space<vmem>>, vector<16x64xbf16>
      tpu.vector_store %arg11[%c0_30, %c0_31], %34 {strides = array<i32>} : memref<16x64xbf16, #tpu.memory_space<vmem>>, vector<16x64xbf16>,
    } else {
    }
    %c0_2 = arith.constant 0 : index
    %c0_3 = arith.constant 0 : index
    %c0_4 = arith.constant 0 : index
    %4 = vector.load %arg5[%c0_2, %c0_3, %c0_4] : memref<1x32x128xbf16, #tpu.memory_space<vmem>>, vector<1x32x128xbf16>
    %5 = vector.shape_cast %4 : vector<1x32x128xbf16> to vector<32x128xbf16>
    %c0_5 = arith.constant 0 : index
    %c0_6 = arith.constant 0 : index
    %c0_7 = arith.constant 0 : index
    %6 = vector.load %arg6[%c0_5, %c0_6, %c0_7] : memref<1x1x128xf32, #tpu.memory_space<vmem>>, vector<1x1x128xf32>
    %7 = vector.shape_cast %6 : vector<1x1x128xf32> to vector<1x128xf32>
    %cst = arith.constant dense<0.000000e+00> : vector<16x128xf32>
    %8 = tpu.matmul %0, %5, %cst {dimension_numbers = #tpu.dot_dimension_numbers<[1], [0], [0], [1], [0, 0, 1, 1], [], []>} : vector<16x32xbf16>, vector<32x128xbf16>, vector<16x128xf32> -> vector<16x128xf32>
    %9 = vector.broadcast %7 : vector<1x128xf32> to vector<16x128xf32>
    %10 = arith.addf %8, %9 : vector<16x128xf32>
    %cst_8 = arith.constant 0.000000e+00 : f32
    %11 = vector.broadcast %cst_8 : f32 to vector<16x128xf32>
    %12 = arith.maximumf %10, %11 : vector<16x128xf32>
    %13 = arith.truncf %12 : vector<16x128xf32> to vector<16x128xbf16>
    %c0_9 = arith.constant 0 : index
    %c0_10 = arith.constant 0 : index
    %14 = vector.load %arg11[%c0_9, %c0_10] : memref<16x64xbf16, #tpu.memory_space<vmem>>, vector<16x64xbf16>
    %c0_11 = arith.constant 0 : index
    %c0_12 = arith.constant 0 : index
    %c0_13 = arith.constant 0 : index
    %15 = vector.load %arg7[%c0_11, %c0_12, %c0_13] : memref<1x64x128xbf16, #tpu.memory_space<vmem>>, vector<1x64x128xbf16>
    %16 = vector.shape_cast %15 : vector<1x64x128xbf16> to vector<64x128xbf16>
    %cst_14 = arith.constant dense<0.000000e+00> : vector<16x128xf32>
    %17 = tpu.matmul %14, %16, %cst_14 {dimension_numbers = #tpu.dot_dimension_numbers<[1], [0], [0], [1], [0, 0, 1, 1], [], []>} : vector<16x64xbf16>, vector<64x128xbf16>, vector<16x128xf32> -> vector<16x128xf32>
    %c0_15 = arith.constant 0 : index
    %c0_16 = arith.constant 0 : index
    %c0_17 = arith.constant 0 : index
    %18 = vector.load %arg8[%c0_15, %c0_16, %c0_17] : memref<1x128x128xbf16, #tpu.memory_space<vmem>>, vector<1x128x128xbf16>
    %19 = vector.shape_cast %18 : vector<1x128x128xbf16> to vector<128x128xbf16>
    %cst_18 = arith.constant dense<0.000000e+00> : vector<16x128xf32>
    %20 = tpu.matmul %13, %19, %cst_18 {dimension_numbers = #tpu.dot_dimension_numbers<[1], [0], [0], [1], [0, 0, 1, 1], [], []>} : vector<16x128xbf16>, vector<128x128xbf16>, vector<16x128xf32> -> vector<16x128xf32>
    %21 = arith.addf %17, %20 : vector<16x128xf32>
    %c0_19 = arith.constant 0 : index
    %c0_20 = arith.constant 0 : index
    %c0_21 = arith.constant 0 : index
    %22 = vector.load %arg9[%c0_19, %c0_20, %c0_21] : memref<1x1x128xf32, #tpu.memory_space<vmem>>, vector<1x1x128xf32>
    %23 = vector.shape_cast %22 : vector<1x1x128xf32> to vector<1x128xf32>
    %24 = vector.broadcast %23 : vector<1x128xf32> to vector<16x128xf32>
    %25 = arith.addf %21, %24 : vector<16x128xf32>
    %c0_22 = arith.constant 0 : index
    %c0_23 = arith.constant 0 : index
    %26 = vector.load %arg10[%c0_22, %c0_23] : memref<16x128xf32, #tpu.memory_space<vmem>>, vector<16x128xf32>
    tpu.vector_store %arg10[%c0_22, %c0_23], %25 {strides = array<i32>} : memref<16x128xf32, #tpu.memory_space<vmem>>, vector<16x128xf32>,
    return
  }
  func.func @transform_0(%arg0: i32, %arg1: i32) -> (i32, i32) {
    %c0_i32 = arith.constant 0 : i32
    %c0_i32_0 = arith.constant 0 : i32
    return %arg0, %c0_i32 : i32, i32
  }
  func.func @transform_1(%arg0: i32, %arg1: i32) -> (i32, i32) {
    %c0_i32 = arith.constant 0 : i32
    %c0_i32_0 = arith.constant 0 : i32
    %c0_i32_1 = arith.constant 0 : i32
    return %c0_i32, %c0_i32_0 : i32, i32
  }
  func.func @transform_2(%arg0: i32, %arg1: i32) -> (i32, i32) {
    %c0_i32 = arith.constant 0 : i32
    %c0_i32_0 = arith.constant 0 : i32
    %c0_i32_1 = arith.constant 0 : i32
    return %c0_i32, %c0_i32_0 : i32, i32
  }
  func.func @transform_3(%arg0: i32, %arg1: i32) -> (i32, i32, i32) {
    %c0_i32 = arith.constant 0 : i32
    %c0_i32_0 = arith.constant 0 : i32
    %c0_i32_1 = arith.constant 0 : i32
    return %arg1, %c0_i32, %c0_i32_0 : i32, i32, i32
  }
  func.func @transform_4(%arg0: i32, %arg1: i32) -> (i32, i32, i32) {
    %c0_i32 = arith.constant 0 : i32
    %c0_i32_0 = arith.constant 0 : i32
    %c0_i32_1 = arith.constant 0 : i32
    return %arg1, %c0_i32, %c0_i32_0 : i32, i32, i32
  }
  func.func @transform_5(%arg0: i32, %arg1: i32) -> (i32, i32, i32) {
    %c0_i32 = arith.constant 0 : i32
    %c0_i32_0 = arith.constant 0 : i32
    %c0_i32_1 = arith.constant 0 : i32
    return %arg1, %c0_i32, %c0_i32_0 : i32, i32, i32
  }
  func.func @transform_6(%arg0: i32, %arg1: i32) -> (i32, i32, i32) {
    %c0_i32 = arith.constant 0 : i32
    %c0_i32_0 = arith.constant 0 : i32
    %c0_i32_1 = arith.constant 0 : i32
    return %arg1, %c0_i32, %c0_i32_0 : i32, i32, i32
  }
  func.func @transform_7(%arg0: i32, %arg1: i32) -> (i32, i32, i32) {
    %c0_i32 = arith.constant 0 : i32
    %c0_i32_0 = arith.constant 0 : i32
    %c0_i32_1 = arith.constant 0 : i32
    return %arg1, %c0_i32, %c0_i32_0 : i32, i32, i32
  }
  func.func @transform_8(%arg0: i32, %arg1: i32) -> (i32, i32) {
    %c0_i32 = arith.constant 0 : i32
    return %arg0, %arg1 : i32, i32
  }
}

module attributes {stable_mosaic.version = 11 : i64} {
  func.func @kernel(%arg0: i32, %arg1: i32, %arg2: memref<16x32xbf16, #tpu.memory_space<vmem>>, %arg3: memref<32x64xbf16, #tpu.memory_space<vmem>>, %arg4: memref<1x64xf32, #tpu.memory_space<vmem>>, %arg5: memref<1x32x128xbf16, #tpu.memory_space<vmem>>, %arg6: memref<1x1x128xf32, #tpu.memory_space<vmem>>, %arg7: memref<1x64x128xbf16, #tpu.memory_space<vmem>>, %arg8: memref<1x128x128xbf16, #tpu.memory_space<vmem>>, %arg9: memref<1x1x128xf32, #tpu.memory_space<vmem>>, %arg10: memref<16x128xf32, #tpu.memory_space<vmem>>, %arg11: memref<16x64xbf16, #tpu.memory_space<vmem>>) attributes {dimension_semantics = [#tpu.dimension_semantics<parallel>, #tpu.dimension_semantics<arbitrary>], iteration_bounds = array<i64: 3, 2>, scalar_prefetch = 0 : i64, scratch_operands = 1 : i64, tpu.core_type = #tpu.core_type<tc>, window_params = [{transform_indices = @transform_0, window_bounds = array<i64: 16, 32>}, {pipeline_mode = #tpu.pipeline_mode<synchronous>, transform_indices = @transform_1, window_bounds = array<i64: 32, 64>}, {pipeline_mode = #tpu.pipeline_mode<synchronous>, transform_indices = @transform_2, window_bounds = array<i64: 1, 64>}, {transform_indices = @transform_3, window_bounds = array<i64: 1, 32, 128>}, {transform_indices = @transform_4, window_bounds = array<i64: 1, 1, 128>}, {transform_indices = @transform_5, window_bounds = array<i64: 1, 64, 128>}, {transform_indices = @transform_6, window_bounds = array<i64: 1, 128, 128>}, {transform_indices = @transform_7, window_bounds = array<i64: 1, 1, 128>}, {transform_indices = @transform_8, window_bounds = array<i64: 16, 128>}]} {
    %c0 = arith.constant 0 : index
    %c0_0 = arith.constant 0 : index
    %0 = vector.load %arg2[%c0, %c0_0] : memref<16x32xbf16, #tpu.memory_space<vmem>>, vector<16x32xbf16>
    %c0_i32 = arith.constant 0 : i32
    %1 = arith.cmpi eq, %arg1, %c0_i32 : i32
    %2 = arith.extui %1 : i1 to i32
    %c0_i32_1 = arith.constant 0 : i32
    %3 = arith.cmpi ne, %2, %c0_i32_1 : i32
    scf.if %3 {
      %c0_24 = arith.constant 0 : index
      %c0_25 = arith.constant 0 : index
      %27 = vector.load %arg3[%c0_24, %c0_25] : memref<32x64xbf16, #tpu.memory_space<vmem>>, vector<32x64xbf16>
      %c0_26 = arith.constant 0 : index
      %c0_27 = arith.constant 0 : index
      %28 = vector.load %arg4[%c0_26, %c0_27] : memref<1x64xf32, #tpu.memory_space<vmem>>, vector<1x64xf32>
      %cst_28 = arith.constant dense<0.000000e+00> : vector<16x64xf32>
      %29 = tpu.matmul %0, %27, %cst_28 {dimension_numbers = #tpu.dot_dimension_numbers<[1], [0], [0], [1], [0, 0, 1, 1], [], []>} : vector<16x32xbf16>, vector<32x64xbf16>, vector<16x64xf32> -> vector<16x64xf32>
      %30 = vector.broadcast %28 : vector<1x64xf32> to vector<16x64xf32>
      %31 = arith.addf %29, %30 : vector<16x64xf32>
      %cst_29 = arith.constant 0.000000e+00 : f32
      %32 = vector.broadcast %cst_29 : f32 to vector<16x64xf32>
      %33 = arith.maximumf %31, %32 : vector<16x64xf32>
      %34 = arith.truncf %33 : vector<16x64xf32> to vector<16x64xbf16>
      %c0_30 = arith.constant 0 : index
      %c0_31 = arith.constant 0 : index
      %35 = vector.load %arg11[%c0_30, %c0_31] : memref<16x64xbf16, #tpu.memory_space<vmem>>, vector<16x64xbf16>
      tpu.vector_store %arg11[%c0_30, %c0_31], %34 {strides = array<i32>} : memref<16x64xbf16, #tpu.memory_space<vmem>>, vector<16x64xbf16>,
    } else {
    }
    %c0_2 = arith.constant 0 : index
    %c0_3 = arith.constant 0 : index
    %c0_4 = arith.constant 0 : index
    %4 = vector.load %arg5[%c0_2, %c0_3, %c0_4] : memref<1x32x128xbf16, #tpu.memory_space<vmem>>, vector<1x32x128xbf16>
    %5 = vector.shape_cast %4 : vector<1x32x128xbf16> to vector<32x128xbf16>
    %c0_5 = arith.constant 0 : index
    %c0_6 = arith.constant 0 : index
    %c0_7 = arith.constant 0 : index
    %6 = vector.load %arg6[%c0_5, %c0_6, %c0_7] : memref<1x1x128xf32, #tpu.memory_space<vmem>>, vector<1x1x128xf32>
    %7 = vector.shape_cast %6 : vector<1x1x128xf32> to vector<1x128xf32>
    %cst = arith.constant dense<0.000000e+00> : vector<16x128xf32>
    %8 = tpu.matmul %0, %5, %cst {dimension_numbers = #tpu.dot_dimension_numbers<[1], [0], [0], [1], [0, 0, 1, 1], [], []>} : vector<16x32xbf16>, vector<32x128xbf16>, vector<16x128xf32> -> vector<16x128xf32>
    %9 = vector.broadcast %7 : vector<1x128xf32> to vector<16x128xf32>
    %10 = arith.addf %8, %9 : vector<16x128xf32>
    %cst_8 = arith.constant 0.000000e+00 : f32
    %11 = vector.broadcast %cst_8 : f32 to vector<16x128xf32>
    %12 = arith.maximumf %10, %11 : vector<16x128xf32>
    %13 = arith.truncf %12 : vector<16x128xf32> to vector<16x128xbf16>
    %c0_9 = arith.constant 0 : index
    %c0_10 = arith.constant 0 : index
    %14 = vector.load %arg11[%c0_9, %c0_10] : memref<16x64xbf16, #tpu.memory_space<vmem>>, vector<16x64xbf16>
    %c0_11 = arith.constant 0 : index
    %c0_12 = arith.constant 0 : index
    %c0_13 = arith.constant 0 : index
    %15 = vector.load %arg7[%c0_11, %c0_12, %c0_13] : memref<1x64x128xbf16, #tpu.memory_space<vmem>>, vector<1x64x128xbf16>
    %16 = vector.shape_cast %15 : vector<1x64x128xbf16> to vector<64x128xbf16>
    %cst_14 = arith.constant dense<0.000000e+00> : vector<16x128xf32>
    %17 = tpu.matmul %14, %16, %cst_14 {dimension_numbers = #tpu.dot_dimension_numbers<[1], [0], [0], [1], [0, 0, 1, 1], [], []>} : vector<16x64xbf16>, vector<64x128xbf16>, vector<16x128xf32> -> vector<16x128xf32>
    %c0_15 = arith.constant 0 : index
    %c0_16 = arith.constant 0 : index
    %c0_17 = arith.constant 0 : index
    %18 = vector.load %arg8[%c0_15, %c0_16, %c0_17] : memref<1x128x128xbf16, #tpu.memory_space<vmem>>, vector<1x128x128xbf16>
    %19 = vector.shape_cast %18 : vector<1x128x128xbf16> to vector<128x128xbf16>
    %cst_18 = arith.constant dense<0.000000e+00> : vector<16x128xf32>
    %20 = tpu.matmul %13, %19, %cst_18 {dimension_numbers = #tpu.dot_dimension_numbers<[1], [0], [0], [1], [0, 0, 1, 1], [], []>} : vector<16x128xbf16>, vector<128x128xbf16>, vector<16x128xf32> -> vector<16x128xf32>
    %21 = arith.addf %17, %20 : vector<16x128xf32>
    %c0_19 = arith.constant 0 : index
    %c0_20 = arith.constant 0 : index
    %c0_21 = arith.constant 0 : index
    %22 = vector.load %arg9[%c0_19, %c0_20, %c0_21] : memref<1x1x128xf32, #tpu.memory_space<vmem>>, vector<1x1x128xf32>
    %23 = vector.shape_cast %22 : vector<1x1x128xf32> to vector<1x128xf32>
    %24 = vector.broadcast %23 : vector<1x128xf32> to vector<16x128xf32>
    %25 = arith.addf %21, %24 : vector<16x128xf32>
    %c0_22 = arith.constant 0 : index
    %c0_23 = arith.constant 0 : index
    %26 = vector.load %arg10[%c0_22, %c0_23] : memref<16x128xf32, #tpu.memory_space<vmem>>, vector<16x128xf32>
    tpu.vector_store %arg10[%c0_22, %c0_23], %25 {strides = array<i32>} : memref<16x128xf32, #tpu.memory_space<vmem>>, vector<16x128xf32>,
    return
  }
  func.func @transform_0(%arg0: i32, %arg1: i32) -> (i32, i32) {
    %c0_i32 = arith.constant 0 : i32
    %c0_i32_0 = arith.constant 0 : i32
    return %arg0, %c0_i32 : i32, i32
  }
  func.func @transform_1(%arg0: i32, %arg1: i32) -> (i32, i32) {
    %c0_i32 = arith.constant 0 : i32
    %c0_i32_0 = arith.constant 0 : i32
    %c0_i32_1 = arith.constant 0 : i32
    return %c0_i32, %c0_i32_0 : i32, i32
  }
  func.func @transform_2(%arg0: i32, %arg1: i32) -> (i32, i32) {
    %c0_i32 = arith.constant 0 : i32
    %c0_i32_0 = arith.constant 0 : i32
    %c0_i32_1 = arith.constant 0 : i32
    return %c0_i32, %c0_i32_0 : i32, i32
  }
  func.func @transform_3(%arg0: i32, %arg1: i32) -> (i32, i32, i32) {
    %c0_i32 = arith.constant 0 : i32
    %c0_i32_0 = arith.constant 0 : i32
    %c0_i32_1 = arith.constant 0 : i32
    return %arg1, %c0_i32, %c0_i32_0 : i32, i32, i32
  }
  func.func @transform_4(%arg0: i32, %arg1: i32) -> (i32, i32, i32) {
    %c0_i32 = arith.constant 0 : i32
    %c0_i32_0 = arith.constant 0 : i32
    %c0_i32_1 = arith.constant 0 : i32
    return %arg1, %c0_i32, %c0_i32_0 : i32, i32, i32
  }
  func.func @transform_5(%arg0: i32, %arg1: i32) -> (i32, i32, i32) {
    %c0_i32 = arith.constant 0 : i32
    %c0_i32_0 = arith.constant 0 : i32
    %c0_i32_1 = arith.constant 0 : i32
    return %arg1, %c0_i32, %c0_i32_0 : i32, i32, i32
  }
  func.func @transform_6(%arg0: i32, %arg1: i32) -> (i32, i32, i32) {
    %c0_i32 = arith.constant 0 : i32
    %c0_i32_0 = arith.constant 0 : i32
    %c0_i32_1 = arith.constant 0 : i32
    return %arg1, %c0_i32, %c0_i32_0 : i32, i32, i32
  }
  func.func @transform_7(%arg0: i32, %arg1: i32) -> (i32, i32, i32) {
    %c0_i32 = arith.constant 0 : i32
    %c0_i32_0 = arith.constant 0 : i32
    %c0_i32_1 = arith.constant 0 : i32
    return %arg1, %c0_i32, %c0_i32_0 : i32, i32, i32
  }
  func.func @transform_8(%arg0: i32, %arg1: i32) -> (i32, i32) {
    %c0_i32 = arith.constant 0 : i32
    return %arg0, %arg1 : i32, i32
  }
}

</mosaic_0001>

<bundles_post_ra>
// kernel: tpu_custom_call.1
= control target key start
LH: loop header
LB: loop body
LE: loop exit
PB: predicated region body
PF: predicated region fallthrough
CT: control target
= control target key end

     0   :  { %s1874_s0 = inlined_call_operand.vmem [shape: bf16[48,32], index: 0, kind: input, shape index: {}]   ;;  %s1875_s1 = inlined_call_operand.hbm [shape: bf16[32,64], index: 1, kind: input, shape index: {}]   ;;  %s1876_s2 = inlined_call_operand.vmem [shape: f32[1,64], index: 2, kind: input, shape index: {}]   ;;  %s1877_s3 = inlined_call_operand.vmem [shape: bf16[2,32,128], index: 3, kind: input, shape index: {}]   ;;  %s1878_s4 = inlined_call_operand.vmem [shape: f32[2,1,128], index: 4, kind: input, shape index: {}]   ;;  %s1879_s5 = inlined_call_operand.hbm [shape: bf16[2,64,128], index: 5, kind: input, shape index: {}]   ;;  %s1880_s6 = inlined_call_operand.hbm [shape: bf16[2,128,128], index: 6, kind: input, shape index: {}]   ;;  %s1881_s7 = inlined_call_operand.vmem [shape: f32[2,1,128], index: 7, kind: input, shape index: {}]   ;;  %s1882_s8 = inlined_call_operand.hbm [shape: f32[48,256], index: 8, kind: output, shape index: {}]  }
   0x1   :  { %1894 = sst [smem:[#allocation17_spill]] %s1874_s0 }
   0x2   :  { %1895 = sst [smem:[#allocation18_spill]] %s1875_s1 }
   0x3   :  { %1896 = sst [smem:[#allocation19_spill]] %s1876_s2 }
   0x4   :  { %1897 = sst [smem:[#allocation20_spill]] %s1877_s3 }
   0x5   :  { %1898 = sst [smem:[#allocation21_spill]] %s1878_s4 }
   0x6   :  { %1899 = sst [smem:[#allocation22_spill]] %s1879_s5 }
   0x7   :  { %1900 = sst [smem:[#allocation23_spill]] %s1880_s6 }
   0x8   :  { %1901 = sst [smem:[#allocation24_spill]] %s1881_s7 }
   0x9   :  { %1902 = sst [smem:[#allocation25_spill]] %s1882_s8 }
   0xa   :  { %13 = vsyncpa [#allocation4], 0 }
   0xb   :  { %14 = vsyncpa [#allocation7], 0 }
   0xc   :  { %16 = vsyncpa [#allocation7 + $0x1], 0 }
   0xd   :  { %17 = vsyncpa [#allocation5], 0 }
   0xe   :  { %19 = vsyncpa [#allocation5 + $0x1], 0  ;;  %s1544_s27 = smov 0   ;;  %s1546_s28 = smov 0  }
   0xf   :  { %s1548_s29 = smov 0   ;;  %s1550_s30 = smov 0  }
  0x10   :  { %s1552_s9 = smov 0   ;;  %s1554_s10 = smov 0  }
  0x11   :  { %s1556_s11 = smov 0   ;;  %s1558_s12 = smov 0  }
  0x12   :  { %s1560_s13 = smov 0   ;;  %s1562_s14 = smov 0  }
  0x13   :  { %s1564_s15 = smov 0  }
  0x14 LB: > { %1903 = sst [smem:[#allocation13_spill]] %s1476_s13  ;;  %s34_s16 = sadd.s32 1, %s1476_s13  ;;  %s1484_s15 = sphi %s1564_s15, %s25_s15   ;;  %s1480_s14 = sphi %s1562_s14, %s1933_s14   ;;  %s1476_s13 = sphi %s1560_s13, %s1932_s13   ;;  %s1472_s12 = sphi %s1558_s12, %s1931_s12   ;;  %s1468_s11 = sphi %s1556_s11, %s1930_s11   ;;  %s1464_s10 = sphi %s1554_s10, %s1939_s10   ;;  %s1460_s9 = sphi %s1552_s9, %s1938_s9   ;;  %s1456_s30 = sphi %s1550_s30, %s1937_s30   ;;  %s1452_s29 = sphi %s1548_s29, %s1936_s29   ;;  %s1448_s28 = sphi %s1546_s28, %s1935_s28   ;;  %s1444_s27 = sphi %s1544_s27, %s1934_s27  }
  0x15   : > { %1904 = sst [smem:[#allocation14_spill]] %s1480_s14  ;;  %s37_s17 = sadd.s32 1, %s1480_s14 }
  0x16   : > { %p35_p0 = scmp.ge.s32.totalorder %s34_s16, 2  ;;  %s164_s18 = sadd.s32 1, %s1464_s10 }
  0x17   : > { %p171_p1 = scmp.ne.s32.totalorder %s1464_s10, %s1460_s9  ;;  %p172_p2 = scmp.eq.s32.totalorder %s1484_s15, 0 }
  0x18   : > { %s1941_s16 = smov (%p35_p0, %s34_s16), 0  ;;  %s1943_s17 = smov (!%p35_p0, %s37_s17), %s1480_s14 }
  0x19   : > { %1905 = sst [smem:[#allocation15_spill]] %s1941_s16  ;;  %s161_s19 = ssub.s32 %s1476_s13, %s1941_s16 }
  0x1a   : > { %p1610_p3 = por %p172_p2, %p171_p1  ;;  %p39_p4 = scmp.ge.s32.totalorder %s1943_s17, 3 }
  0x1b   : > { %p162_p5 = scmp.eq.s32.totalorder %s161_s19, 0  ;;  %p1160_p6 = scmp.lt.s32.totalorder %s1484_s15, 6 }
  0x1c   : > { %s1945_s17 = smov (%p39_p4, %s1943_s17), 0  ;;  %s320_s24 = sand.u32 1, %s1484_s15  }
  0x1d   : > { %1907 = sst [smem:[#allocation16_spill]] %s1945_s17  ;;  %s239_s22 = ssub.s32 %s1480_s14, %s1945_s17 }
  0x1e   : > { %s1617_s21 = scalar_select %p162_p5, %s1464_s10, %s164_s18  }
  0x1f   : > { %s1621_s23 = sor.u32 %s239_s22, %s161_s19  ;;  %s322_s25 = sand.u32 1, %s1464_s10  }
  0x20   : > { %p242_p7 = scmp.eq.s32.totalorder %s1621_s23, 0  ;;  %s1011_s26 = sshll.u32 %s322_s25, 5 }
  0x21   : > { %s1060_s16 = sshll.u32 %s1476_s13, 9  ;;  %s1908_s5 = sld [smem:[#allocation22_spill]] }
  0x22   : > { %s324_s3 = scalar_lea.vmem [#allocation6], %s1011_s26  ;;  %p1633_p8 = pnand %p1160_p6, %p1610_p3 }
  0x23   : > { %s331_s4 = sshll.u32 %s324_s3, 4  ;;  %s1014_s19 = sshll.u32 %s322_s25, 6  ;;  %s332_s4 = int_to_ptr.vmem [resolvable:$true] %s331_s4 }
  0x24   : > { %s1637_s22 = scalar_lea.sflag [#allocation7], %s320_s24  ;;  %p1280_p9 = pneg %p1633_p8 }
  0x25   : > { %s1291_s17 = scalar_lea.vmem %s332_s4, 512  ;;  %s1486_s2 = smov [#allocation6]  }
  0x26   : > { %p1292_p10 = scmp.ne.s32.totalorder %s332_s4, %s1291_s17  ;;  %s1296_s3 = sshll.u32 %s1486_s2, 4  ;;  %s1297_s3 = int_to_ptr.vmem [resolvable:$false] %s1296_s3 }
  0x27   : > { %s330_s7 = scalar_lea.hbm %s1908_s5, %s1060_s16  ;;  %s1298_s8 = scalar_lea.vmem %s1297_s3, 1024 }
  0x28   : > { %p1294_p11 = pnand %p1292_p10, %p1280_p9  ;;  %p1299_p13 = scmp.lt.s32.totalorder %s332_s4, %s1297_s3 }
  0x29   : > { %p1300_p0 = scmp.lt.s32.totalorder %s1298_s8, %s1291_s17 }
  0x2a   : > { %p1295_p12 = pneg %p1294_p11 }
  0x2b   : > { %p1301_p1 = por %p1300_p0, %p1299_p13 }
  0x2d   : > { %p1302_p2 = pnand %p1301_p1, %p1295_p12 }
  0x2f   : > { %1305 = shalt.err (!%p1302_p2)
}
  0x30   : > { %s1886_s16 = smov 64   ;;  %s1888_s20 = smov 4  }
  0x31   : > { %1151 = dma.hbm_to_vmem [thread:$0]  (!%p1633_p8), %s330_s7, 512, %s332_s4, %s1637_s22, %s1886_s16, %s1886_s16, %s1888_s20  }
  0x32   : > { %s345_s17 = scalar_lea.vmem [#allocation8], %s1014_s19  ;;  %s1651_s25 = sadd.s32 4294967295, %s1484_s15  }
  0x33   : > { %s352_s24 = sshll.u32 %s345_s17, 4  ;;  %s1007_s26 = sadd.s32 4294967294, %s1484_s15   ;;  %s353_s24 = int_to_ptr.vmem [resolvable:$true] %s352_s24 }
  0x34   : > { %p177_p3 = scmp.ne.s32.totalorder %s1460_s9, %s1456_s30  ;;  %p178_p4 = scmp.eq.s32.totalorder %s1651_s25, 0 }
  0x35   : > { %s244_s2 = sadd.s32 1, %s1452_s29  ;;  %p254_p6 = scmp.ne.s32.totalorder %s1452_s29, %s1448_s28 }
  0x36   : > { %s1661_s3 = scalar_select %p242_p7, %s1452_s29, %s244_s2  }
  0x37   : > { %p1665_p5 = por %p178_p4, %p177_p3  ;;  %p255_p10 = scmp.eq.s32.totalorder %s1651_s25, 5 }
  0x38   : > { %p260_p11 = scmp.ne.s32.totalorder %s1448_s28, %s1444_s27  ;;  %p261_p12 = scmp.eq.s32.totalorder %s1007_s26, 5 }
  0x39   : > { %p1008_p13 = scmp.ge.s32.totalorder %s1484_s15, 1  ;;  %p1675_p0 = por %p255_p10, %p254_p6 }
  0x3a   : > { %p268_p1 = scmp.lt.s32.totalorder %s1484_s15, 7  ;;  %p1680_p2 = por %p261_p12, %p260_p11 }
  0x3b   : > { %s1911_s4 = scalar_select %p1675_p0, 1, 0 }
  0x3c   : > { %s1912_s7 = scalar_select %p1680_p2, 1, 0 }
  0x3d   : > { %p1684_p7 = pnand %p1008_p13, %p268_p1  ;;  %s1489_s23 = smov [#allocation3]  }
  0x3e   : > { %s280_s19 = sshll.u32 %s1489_s23, 4  ;;  %s1061_s17 = sshll.u32 %s1476_s13, 10  ;;  %s1694_s19 = int_to_ptr.vmem [resolvable:$true] %s280_s19 }
  0x3f   : > { %p1144_p3 = pneg %p1684_p7  ;;  %s1914_s6 = sld [smem:[#allocation23_spill]] }
  0x40   : > { %s1319_s5 = scalar_lea.vmem %s353_s24, 1024  ;;  %s1490_s23 = smov [#allocation8]  }
  0x41   : > { %p1698_p6 = pnand %p1144_p3, %p178_p4  ;;  %p1320_p10 = scmp.ne.s32.totalorder %s353_s24, %s1319_s5 }
  0x42   : > { %s1324_s14 = sshll.u32 %s1490_s23, 4  ;;  %s1325_s14 = int_to_ptr.vmem [resolvable:$false] %s1324_s14 }
  0x43   : > { %p1322_p11 = pnand %p1320_p10, %p1280_p9  ;;  %s1326_s13 = scalar_lea.vmem %s1325_s14, 2048 }
  0x44   : > { %p1327_p13 = scmp.lt.s32.totalorder %s353_s24, %s1325_s14  ;;  %p1328_p1 = scmp.lt.s32.totalorder %s1326_s13, %s1319_s5 }
  0x45   : > { %s351_s16 = scalar_lea.hbm %s1914_s6, %s1061_s17  ;;  %p1323_p12 = pneg %p1322_p11 }
  0x46   : > { %p1329_p2 = por %p1328_p1, %p1327_p13 }
  0x48   : > { %p1330_p0 = pnand %p1329_p2, %p1323_p12 }
  0x4a   : > { %1333 = shalt.err (!%p1330_p0)
}
  0x4b   : > { %s1916_s17 = smov 4   ;;  %s1917_s26 = smov 64  }
  0x4c   : > { %1154 = dma.hbm_to_vmem [thread:$0]  (!%p1633_p8), %s351_s16, 1024, %s353_s24, %s1637_s22, %s1917_s26, %s1917_s26, %s1916_s17  }
  0x4d   : > { %p1336_p9 = pneg %p1698_p6  ;;  %s1345_s2 = scalar_lea.vmem %s1694_s19, 256 }
  0x4e   : > { %p1346_p3 = scmp.ne.s32.totalorder %s1694_s19, %s1345_s2  ;;  %p1353_p2 = scmp.lt.s32.totalorder %s1694_s19, %s1694_s19 }
  0x4f   : > { %p1354_p0 = scmp.lt.s32.totalorder %s1345_s2, %s1345_s2 }
  0x50   : > { %p1348_p10 = pnand %p1346_p3, %p1336_p9 }
  0x51   : > { %p1355_p12 = por %p1354_p0, %p1353_p2 }
  0x52   : > { %p1349_p11 = pneg %p1348_p10 }
  0x54   : > { %p1356_p13 = pnand %p1355_p12, %p1349_p11 }
  0x56   : > { %1359 = shalt.err (!%p1356_p13)
}
  0x57   : > { %s1918_s1 = sld [smem:[#allocation18_spill]] }
  0x59   : > { %370 = sbr.rel (%p1684_p7) target bundleno = 756 (0x2f4), region = 52 }
  0x5d   : > { %1147 = dma.hbm_to_vmem [thread:$0]  (!%p1698_p6), %s1918_s1, 256, %s1694_s19, [#allocation4], %s1917_s26, %s1917_s26, %s1916_s17  }
  0x5e   : > { %1431 = dma.done.wait (%p178_p4), [#allocation4], 256  }
  0x5f   : > { %1433 = vsyncadd (%p178_p4), [#allocation4], 4294967040  ;;  %s376_s14 = sand.u32 1, %s1651_s25   ;;  %s378_s18 = sand.u32 1, %s1460_s9  }
  0x60   : > { %s1019_s22 = sshll.u32 %s378_s18, 5  ;;  %s377_s16 = scalar_lea.sflag [#allocation7], %s376_s14 }
  0x61   : > { %s1734_s20 = scalar_lea.vmem [#allocation6], %s1019_s22 }
  0x62   : > { %1435 = dma.done.wait (%p1665_p5), %s377_s16, 1536  }
  0x63   : > { %1437 = vsyncadd (%p1665_p5), %s377_s16, 4294965760  ;;  %s1022_s24 = sshll.u32 %s1472_s12, 1  ;;  %s1020_s30 = sshll.u32 %s378_s18, 6 }
  0x64   : > { %p444_p8 = scmp.lt.s32.totalorder %s1022_s24, 5  ;;  %s1893_s19 = sand.u32 1, %s1448_s28  }
  0x65   : > { %p449_p4 = scmp.lt.s32.totalorder %s1468_s11, 1  ;;  %s1021_s25 = sshll.u32 %s1893_s19, 4 }
  0x66   : > { %s1947_s24 = smov (!%p444_p8, %s1022_s24), 5  ;;  %s1919_s0 = sld [smem:[#allocation17_spill]] }
  0x67   : > { %s1023_s23 = sshll.u32 %s1947_s24, 2  ;;  %s1920_s18 = sld [smem:[#allocation21_spill]] }
  0x68   : > { %s1749_s8 = scalar_select %p449_p4, %s1468_s11, 1 }
  0x69   : > { %s1921_s19 = sld [smem:[#allocation20_spill]]  ;;  %p1026_p5 = scmp.ne.s32.totalorder %s1468_s11, 0 }
  0x6a   : > { %s1062_s5 = sshll.u32 %s1749_s8, 4 }
  0x6c   : > { %s447_s2 = scalar_lea.vmem %s1919_s0, %s1023_s23  ;;  %s1922_s23 = sld [smem:[#allocation24_spill]] }
  0x6d   : > { %v462_v0 = vld [vmem:[%s447_s2] sm:$0xf]  ;;  %v463_v1 = vld [vmem:[%s447_s2 + $0x4] sm:$0xf]  ;;  %s456_s22 = scalar_lea.vmem %s1920_s18, %s1749_s8  ;;  %s1765_s2 = scalar_lea.vmem [#allocation8], %s1020_s30 }
  0x6e   : > { %s1767_s0 = scalar_lea.vmem [#allocation9], %s1021_s25  ;;  %467 = sbr.rel (%p1026_p5) target bundleno = 328 (0x148), region = 68 }
  0x6f   : > { %s1759_s24 = scalar_lea.vmem %s1921_s19, %s1062_s5  ;;  %s1923_s30 = sld [smem:[#allocation19_spill]] (!%p1026_p5) }
  0x72   : > { %s459_s26 = scalar_lea.vmem %s1922_s23, %s1749_s8 }
  0x73   : > { %v1261_v2 = vld [vmem:[#allocation3 + $0x8] sm:$0xff]   ;;  %v1491_v3 = vmov 0.0   ;;  %v1262_v4 = vld [vmem:[#allocation3] sm:$0xff]   ;;  %vm1492_vm0 = vmmov 0   ;;  %v1028_v5 = vcombine.low %v462_v0, %v463_v1  ;;  %vm496_vm1 = vcmask 261120  }
  0x74   : > { %1086 = vmatprep.subr.bf16.mxu0 %v1491_v3  ;;  %1090 = vmatprep.mubr.msk.bf16.mxu0 %vm1492_vm0, %v1491_v3  ;;  %vm551_vm2 = vcmask 519168  }
  0x75   : > { %1087 = vmatpush3.bf16.msra.mxu0 %v1261_v2  ;;  %v1027_v6 = vld [vmem:[%s1923_s30] ss:$0 sm:$0xff] }
  0x76   : > { %1088 = vmatprep.subr.bf16.mxu0 %v1491_v3 }
  0x79   : > { %1089 = vmatpush3.bf16.msra.mxu0 %v1262_v4 }
  0x7c   : > { %1091 = vmatmul.mubr.msk.bf16.vlgmr.msra.gmra.mxu0 %vm496_vm1, %v1028_v5 }
 0x13c   : > { %v534_v7 = vpop.f32.mrf.mxu0 }
 0x13d   : > { %v535_v8 = vadd.f32 %v1027_v6, %v534_v7 }
 0x13e   : > { %v1092_v9 = vpop.f32.mrf.mxu0 }
 0x13f   : > { %v541_v10 = vmax.f32 %v535_v8, 0.0 }
 0x140   : > { %v537_v11 = vpop.f32.mrf.mxu0 }
 0x141   : > { %v1063_v12 = vpack.c.bf16 %v541_v10, %v541_v10  ;;  %v538_v13 = vadd.f32 %v1027_v6, %v537_v11 }
 0x142   : > { %v1093_v14 = vpop.f32.mrf.mxu0 }
 0x143   : > { %552 = vst.msk [vmem:[#allocation2] sm:$0xf] %vm551_vm2, %v1063_v12  ;;  %v542_v15 = vmax.f32 %v538_v13, 0.0 }
 0x145   : > { %v1064_v16 = vpack.c.bf16 %v542_v15, %v542_v15 }
 0x147   : > { %553 = vst.msk [vmem:[#allocation2 + $0x4] sm:$0xf] %vm551_vm2, %v1064_v16 }
 0x148 PF: > { %v1263_v17 = vld [vmem:[%s1759_s24 + $0x8] sm:$0xff]   ;;  %v1493_v18 = vmov 0.0   ;;  %v1264_v19 = vld [vmem:[%s1759_s24] sm:$0xff]   ;;  %vm1494_vm3 = vmmov 0   ;;  %v1265_v20 = vld [vmem:[%s1765_s2 + $0x38] sm:$0xff]   ;;  %v1035_v22 = vcombine.low %v462_v0, %v463_v1  ;;  %vm582_vm4 = vcmask 261120  }
 0x149   : > { %1094 = vmatprep.subr.bf16.mxu0 %v1493_v18  ;;  %1102 = vmatprep.subr.bf16.mxu1 %v1493_v18  ;;  %v1266_v21 = vld [vmem:[%s1765_s2 + $0x30] sm:$0xff]   ;;  %v1268_v23 = vld [vmem:[%s1734_s20 + $0x18] sm:$0xff]   ;;  %v1267_v24 = vld [vmem:[%s1765_s2 + $0x28] sm:$0xff]   ;;  %vm774_vm5 = vcmask 523264   ;;  %s846_s24 = sshll.u32 %s1767_s0, 4  ;;  %s1926_s23 = sld [smem:[#allocation25_spill]]  ;;  %s1809_s24 = int_to_ptr.vmem [resolvable:$true] %s846_s24 }
 0x14a   : > { %1095 = vmatpush3.bf16.msra.mxu0 %v1263_v17  ;;  %1098 = vmatprep.mubr.msk.bf16.mxu0 %vm1494_vm3, %v1493_v18  ;;  %v1269_v25 = vld [vmem:[%s1765_s2 + $0x20] sm:$0xff]   ;;  %v1270_v26 = vld [vmem:[%s1734_s20 + $0x10] sm:$0xff]   ;;  %v1272_v27 = vld [vmem:[%s1734_s20 + $0x8] sm:$0xff]   ;;  %s1927_s8 = sand.u32 1, %s1448_s28   ;;  %p1928_p6 = scmp.ne.s32.totalorder %s1911_s4, 0 }
 0x14b   : > { %1096 = vmatprep.subr.bf16.mxu0 %v1493_v18  ;;  %1118 = vmatprep.mubr.msk.bf16.mxu1 %vm1494_vm3, %v1493_v18  ;;  %v1271_v28 = vld [vmem:[%s1765_s2 + $0x18] sm:$0xff]   ;;  %v1273_v29 = vld [vmem:[%s1765_s2 + $0x10] sm:$0xff]   ;;  %v1274_v30 = vld [vmem:[%s1734_s20] sm:$0xff]   ;;  %s1065_s20 = sshll.u32 %s1472_s12, 2  ;;  %s1495_s1 = smov [#allocation9]  }
 0x14c   : > { %1103 = vmatpush3.bf16.msra.mxu1 %v1265_v20  ;;  %v1275_v31 = vld [vmem:[%s1765_s2 + $0x8] sm:$0xff]   ;;  %v1277_v33 = vld [vmem:[%s1765_s2] sm:$0xff]   ;;  %s843_s13 = sadd.s32 %s1468_s11, %s1065_s20  ;;  %s1360_s2 = scalar_lea.vmem %s1809_s24, 256 }
 0x14d   : > { %1104 = vmatprep.subr.bf16.mxu1 %v1493_v18  ;;  %v1034_v34 = vld [vmem:[%s456_s22] ss:$0 sm:$0xff]  ;;  %s1057_s16 = sshll.u32 %s843_s13, 7  ;;  %p1361_p7 = scmp.ne.s32.totalorder %s1809_s24, %s1360_s2 }
 0x14e   : > { %1097 = vmatpush3.bf16.msra.mxu0 %v1264_v19  ;;  %v1276_v32 = vld [vmem:[#allocation2] sm:$0xff]   ;;  %s1364_s6 = sshll.u32 %s1495_s1, 4  ;;  %s1365_s6 = int_to_ptr.vmem [resolvable:$false] %s1364_s6 }
 0x14f   : > { %1122 = vmatprep.subr.bf16.mxu0 %v1493_v18  ;;  %v1053_v49 = vld [vmem:[%s459_s26] ss:$0 sm:$0xff]  ;;  %s1807_s11 = scalar_lea.hbm %s1926_s23, %s1057_s16  ;;  %s1814_s26 = scalar_lea.sflag [#allocation5], %s1927_s8 }
 0x150   : > { %1105 = vmatpush3.bf16.msra.mxu1 %v1266_v21  ;;  %p1362_p1 = pnand %p1361_p7, %p1928_p6  ;;  %s1366_s30 = scalar_lea.vmem %s1365_s6, 512 }
 0x151   : > { %1099 = vmatmul.mubr.msk.bf16.vlgmr.msra.gmra.mxu0 %vm582_vm4, %v1035_v22  ;;  %1106 = vmatprep.subr.bf16.mxu1 %v1493_v18  ;;  %p1367_p3 = scmp.lt.s32.totalorder %s1809_s24, %s1365_s6  ;;  %p1368_p10 = scmp.lt.s32.totalorder %s1366_s30, %s1360_s2 }
 0x152   : > { %1123 = vmatpush3.bf16.msra.mxu0 %v1268_v23  ;;  %1130 = vmatprep.mubr.msk.bf16.mxu0 %vm1494_vm3, %v1493_v18  ;;  %p1363_p9 = pneg %p1362_p1 }
 0x153   : > { %1124 = vmatprep.subr.bf16.mxu0 %v1493_v18  ;;  %p1369_p11 = por %p1368_p10, %p1367_p3 }
 0x154   : > { %1107 = vmatpush3.bf16.msra.mxu1 %v1267_v24 }
 0x155   : > { %1108 = vmatprep.subr.bf16.mxu1 %v1493_v18  ;;  %p1370_p2 = pnand %p1369_p11, %p1363_p9 }
 0x156   : > { %1125 = vmatpush3.bf16.msra.mxu0 %v1270_v26 }
 0x157   : > { %1126 = vmatprep.subr.bf16.mxu0 %v1493_v18 }
 0x158   : > { %1109 = vmatpush3.bf16.msra.mxu1 %v1269_v25 }
 0x159   : > { %1110 = vmatprep.subr.bf16.mxu1 %v1493_v18 }
 0x15a   : > { %1127 = vmatpush3.bf16.msra.mxu0 %v1272_v27 }
 0x15b   : > { %1128 = vmatprep.subr.bf16.mxu0 %v1493_v18 }
 0x15c   : > { %1111 = vmatpush3.bf16.msra.mxu1 %v1271_v28 }
 0x15d   : > { %1112 = vmatprep.subr.bf16.mxu1 %v1493_v18 }
 0x15e   : > { %1129 = vmatpush3.bf16.msra.mxu0 %v1274_v30 }
 0x160   : > { %1113 = vmatpush3.bf16.msra.mxu1 %v1273_v29 }
 0x161   : > { %1114 = vmatprep.subr.bf16.mxu1 %v1493_v18  ;;  %1131 = vmatmul.mubr.msk.bf16.vlgmr.msra.gmra.mxu0 %vm774_vm5, %v1276_v32 }
 0x164   : > { %1115 = vmatpush3.bf16.msra.mxu1 %v1275_v31 }
 0x165   : > { %1116 = vmatprep.subr.bf16.mxu1 %v1493_v18 }
 0x168   : > { %1117 = vmatpush3.bf16.msra.mxu1 %v1277_v33 }
 0x211   : > { %v620_v35 = vpop.f32.mrf.mxu0 }
 0x212   : > { %v621_v37 = vadd.f32 %v1034_v34, %v620_v35 }
 0x213   : > { %v1100_v36 = vpop.f32.mrf.mxu0 }
 0x214   : > { %v627_v41 = vmax.f32 %v621_v37, 0.0 }
 0x215   : > { %v623_v38 = vpop.f32.mrf.mxu0 }
 0x216   : > { %v624_v39 = vadd.f32 %v1034_v34, %v623_v38 }
 0x217   : > { %v1101_v40 = vpop.f32.mrf.mxu0 }
 0x218   : > { %v628_v42 = vmax.f32 %v624_v39, 0.0 }
 0x21a   : > { %v629_v43 = vpack.c.bf16 %v628_v42, %v627_v41 }
 0x21c   : > { %1119 = vmatmul.mubr.bf16.vlgmr.msra.gmra.mxu1 %v629_v43 }
 0x221   : > { %v812_v44 = vpop.f32.mrf.mxu0 }
 0x223   : > { %v1132_v45 = vpop.f32.mrf.mxu0 }
 0x225   : > { %v815_v46 = vpop.f32.mrf.mxu0 }
 0x227   : > { %v1133_v47 = vpop.f32.mrf.mxu0 }
 0x2dc   : > { %v738_v48 = vpop.f32.mrf.mxu1 }
 0x2dd   : > { %v813_v50 = vadd.f32 %v812_v44, %v738_v48 }
 0x2de   : > { %v1120_v51 = vpop.f32.mrf.mxu1 }
 0x2df   : > { %v826_v52 = vadd.f32 %v1053_v49, %v813_v50 }
 0x2e0   : > { %v741_v53 = vpop.f32.mrf.mxu1 }
 0x2e1   : > { %828 = vst [vmem:[%s1767_s0] sm:$0xff] %v826_v52  ;;  %v816_v54 = vadd.f32 %v815_v46, %v741_v53 }
 0x2e2   : > { %v1121_v55 = vpop.f32.mrf.mxu1 }
 0x2e3   : > { %v827_v56 = vadd.f32 %v1053_v49, %v816_v54 }
 0x2e5   : > { %829 = vst [vmem:[%s1767_s0 + $0x8] sm:$0xff] %v827_v56 }
 0x2e6   : > { %1373 = shalt.err (!%p1370_p2)
}
 0x2e7   : > { %s1374_s0 = scalar_lea.hbm %s1807_s11, 256  ;;  %s1378_s5 = scalar_lea.hbm %s1926_s23, 1536 }
 0x2e8   : > { %p1375_p0 = scmp.ne.s32.totalorder %s1807_s11, %s1374_s0  ;;  %p1379_p8 = scmp.lt.s32.totalorder %s1807_s11, %s1926_s23 }
 0x2e9   : > { %p1380_p4 = scmp.lt.s32.totalorder %s1378_s5, %s1374_s0 }
 0x2ea   : > { %p1376_p12 = pnand %p1375_p0, %p1928_p6 }
 0x2eb   : > { %p1381_p5 = por %p1380_p4, %p1379_p8 }
 0x2ec   : > { %p1377_p13 = pneg %p1376_p12 }
 0x2ee   : > { %p1382_p7 = pnand %p1381_p5, %p1377_p13 }
 0x2f0   : > { %1385 = shalt.err (!%p1382_p7)
}
 0x2f1   : > { %s1496_s14 = smov 128   ;;  %s1497_s18 = smov 256  }
 0x2f2   : > { %s1498_s22 = smov 8  }
 0x2f3   : > { %1142 = dma.vmem_to_hbm [thread:$0]  (%p1928_p6), %s1809_s24, 256, %s1807_s11, %s1814_s26, %s1496_s14, %s1497_s18, %s1498_s22  }
 0x2f4 PF: > { %p1162_p1 = scmp.ge.s32.totalorder %s1484_s15, 2  ;;  %s861_s16 = sand.u32 1, %s1444_s27  }
 0x2f5   : > { %p1929_p9 = scmp.ne.s32.totalorder %s1912_s7, 0  ;;  %s862_s17 = scalar_lea.sflag [#allocation5], %s861_s16 }
 0x2f7   : > { %p1156_p3 = pnand %p1162_p1, %p1929_p9 }
 0x2f9   : > { %p1157_p10 = pneg %p1156_p3 }
 0x2fb   : > { %1439 = dma.done.wait (%p1157_p10), %s862_s17, 256  }
 0x2fc   : > { %1441 = vsyncadd (%p1157_p10), %s862_s17, 4294967040  ;;  %s25_s15 = sadd.s32 1, %s1484_s15   ;;  %s1930_s11 = sld [smem:[#allocation13_spill]] }
 0x2fd   : > { %p22_p11 = scmp.ge.s32.totalorder %s25_s15, 8   ;;  %s1931_s12 = sld [smem:[#allocation14_spill]] }
 0x2fe   : > { %s1932_s13 = sld [smem:[#allocation15_spill]]  ;;  %s1934_s27 = smov %s1448_s28 }
 0x2ff   : > { %s1933_s14 = sld [smem:[#allocation16_spill]]  ;;  %s1935_s28 = smov %s1452_s29 }
 0x300   : > { %s1936_s29 = smov %s1661_s3  ;;  %s1937_s30 = smov %s1460_s9 }
 0x301   : > { %s1938_s9 = smov %s1464_s10  ;;  %s1939_s10 = smov %s1617_s21 }
 0x302   :  { %24 = sbr.rel (!%p22_p11) target bundleno = 20 (0x14), region = 129 }
 0x307   :  { %867 = vsyncpa [#allocation4], 1 }
 0x308   :  { %869 = vsyncpa [#allocation4 + $0x1], 1 }
 0x309   :  { %870 = vsyncpa [#allocation7], 1 }
 0x30a   :  { %872 = vsyncpa [#allocation7 + $0x1], 1 }
 0x30b   :  { %873 = vsyncpa [#allocation5], 1 }
 0x30c   :  { %875 = vsyncpa [#allocation5 + $0x1], 1 }

// kernel: tpu_custom_call.1
= control target key start
LH: loop header
LB: loop body
LE: loop exit
PB: predicated region body
PF: predicated region fallthrough
CT: control target
= control target key end

     0   :  { %s1874_s0 = inlined_call_operand.vmem [shape: bf16[48,32], index: 0, kind: input, shape index: {}]   ;;  %s1875_s1 = inlined_call_operand.hbm [shape: bf16[32,64], index: 1, kind: input, shape index: {}]   ;;  %s1876_s2 = inlined_call_operand.vmem [shape: f32[1,64], index: 2, kind: input, shape index: {}]   ;;  %s1877_s3 = inlined_call_operand.vmem [shape: bf16[2,32,128], index: 3, kind: input, shape index: {}]   ;;  %s1878_s4 = inlined_call_operand.vmem [shape: f32[2,1,128], index: 4, kind: input, shape index: {}]   ;;  %s1879_s5 = inlined_call_operand.hbm [shape: bf16[2,64,128], index: 5, kind: input, shape index: {}]   ;;  %s1880_s6 = inlined_call_operand.hbm [shape: bf16[2,128,128], index: 6, kind: input, shape index: {}]   ;;  %s1881_s7 = inlined_call_operand.vmem [shape: f32[2,1,128], index: 7, kind: input, shape index: {}]   ;;  %s1882_s8 = inlined_call_operand.hbm [shape: f32[48,256], index: 8, kind: output, shape index: {}]  }
   0x1   :  { %1894 = sst [smem:[#allocation17_spill]] %s1874_s0 }
   0x2   :  { %1895 = sst [smem:[#allocation18_spill]] %s1875_s1 }
   0x3   :  { %1896 = sst [smem:[#allocation19_spill]] %s1876_s2 }
   0x4   :  { %1897 = sst [smem:[#allocation20_spill]] %s1877_s3 }
   0x5   :  { %1898 = sst [smem:[#allocation21_spill]] %s1878_s4 }
   0x6   :  { %1899 = sst [smem:[#allocation22_spill]] %s1879_s5 }
   0x7   :  { %1900 = sst [smem:[#allocation23_spill]] %s1880_s6 }
   0x8   :  { %1901 = sst [smem:[#allocation24_spill]] %s1881_s7 }
   0x9   :  { %1902 = sst [smem:[#allocation25_spill]] %s1882_s8 }
   0xa   :  { %13 = vsyncpa [#allocation4], 0 }
   0xb   :  { %14 = vsyncpa [#allocation7], 0 }
   0xc   :  { %16 = vsyncpa [#allocation7 + $0x1], 0 }
   0xd   :  { %17 = vsyncpa [#allocation5], 0 }
   0xe   :  { %19 = vsyncpa [#allocation5 + $0x1], 0  ;;  %s1544_s27 = smov 0   ;;  %s1546_s28 = smov 0  }
   0xf   :  { %s1548_s29 = smov 0   ;;  %s1550_s30 = smov 0  }
  0x10   :  { %s1552_s9 = smov 0   ;;  %s1554_s10 = smov 0  }
  0x11   :  { %s1556_s11 = smov 0   ;;  %s1558_s12 = smov 0  }
  0x12   :  { %s1560_s13 = smov 0   ;;  %s1562_s14 = smov 0  }
  0x13   :  { %s1564_s15 = smov 0  }
  0x14 LB: > { %1903 = sst [smem:[#allocation13_spill]] %s1476_s13  ;;  %s34_s16 = sadd.s32 1, %s1476_s13  ;;  %s1484_s15 = sphi %s1564_s15, %s25_s15   ;;  %s1480_s14 = sphi %s1562_s14, %s1933_s14   ;;  %s1476_s13 = sphi %s1560_s13, %s1932_s13   ;;  %s1472_s12 = sphi %s1558_s12, %s1931_s12   ;;  %s1468_s11 = sphi %s1556_s11, %s1930_s11   ;;  %s1464_s10 = sphi %s1554_s10, %s1939_s10   ;;  %s1460_s9 = sphi %s1552_s9, %s1938_s9   ;;  %s1456_s30 = sphi %s1550_s30, %s1937_s30   ;;  %s1452_s29 = sphi %s1548_s29, %s1936_s29   ;;  %s1448_s28 = sphi %s1546_s28, %s1935_s28   ;;  %s1444_s27 = sphi %s1544_s27, %s1934_s27  }
  0x15   : > { %1904 = sst [smem:[#allocation14_spill]] %s1480_s14  ;;  %s37_s17 = sadd.s32 1, %s1480_s14 }
  0x16   : > { %p35_p0 = scmp.ge.s32.totalorder %s34_s16, 2  ;;  %s164_s18 = sadd.s32 1, %s1464_s10 }
  0x17   : > { %p171_p1 = scmp.ne.s32.totalorder %s1464_s10, %s1460_s9  ;;  %p172_p2 = scmp.eq.s32.totalorder %s1484_s15, 0 }
  0x18   : > { %s1941_s16 = smov (%p35_p0, %s34_s16), 0  ;;  %s1943_s17 = smov (!%p35_p0, %s37_s17), %s1480_s14 }
  0x19   : > { %1905 = sst [smem:[#allocation15_spill]] %s1941_s16  ;;  %s161_s19 = ssub.s32 %s1476_s13, %s1941_s16 }
  0x1a   : > { %p1610_p3 = por %p172_p2, %p171_p1  ;;  %p39_p4 = scmp.ge.s32.totalorder %s1943_s17, 3 }
  0x1b   : > { %p162_p5 = scmp.eq.s32.totalorder %s161_s19, 0  ;;  %p1160_p6 = scmp.lt.s32.totalorder %s1484_s15, 6 }
  0x1c   : > { %s1945_s17 = smov (%p39_p4, %s1943_s17), 0  ;;  %s320_s24 = sand.u32 1, %s1484_s15  }
  0x1d   : > { %1907 = sst [smem:[#allocation16_spill]] %s1945_s17  ;;  %s239_s22 = ssub.s32 %s1480_s14, %s1945_s17 }
  0x1e   : > { %s1617_s21 = scalar_select %p162_p5, %s1464_s10, %s164_s18  }
  0x1f   : > { %s1621_s23 = sor.u32 %s239_s22, %s161_s19  ;;  %s322_s25 = sand.u32 1, %s1464_s10  }
  0x20   : > { %p242_p7 = scmp.eq.s32.totalorder %s1621_s23, 0  ;;  %s1011_s26 = sshll.u32 %s322_s25, 5 }
  0x21   : > { %s1060_s16 = sshll.u32 %s1476_s13, 9  ;;  %s1908_s5 = sld [smem:[#allocation22_spill]] }
  0x22   : > { %s324_s3 = scalar_lea.vmem [#allocation6], %s1011_s26  ;;  %p1633_p8 = pnand %p1160_p6, %p1610_p3 }
  0x23   : > { %s331_s4 = sshll.u32 %s324_s3, 4  ;;  %s1014_s19 = sshll.u32 %s322_s25, 6  ;;  %s332_s4 = int_to_ptr.vmem [resolvable:$true] %s331_s4 }
  0x24   : > { %s1637_s22 = scalar_lea.sflag [#allocation7], %s320_s24  ;;  %p1280_p9 = pneg %p1633_p8 }
  0x25   : > { %s1291_s17 = scalar_lea.vmem %s332_s4, 512  ;;  %s1486_s2 = smov [#allocation6]  }
  0x26   : > { %p1292_p10 = scmp.ne.s32.totalorder %s332_s4, %s1291_s17  ;;  %s1296_s3 = sshll.u32 %s1486_s2, 4  ;;  %s1297_s3 = int_to_ptr.vmem [resolvable:$false] %s1296_s3 }
  0x27   : > { %s330_s7 = scalar_lea.hbm %s1908_s5, %s1060_s16  ;;  %s1298_s8 = scalar_lea.vmem %s1297_s3, 1024 }
  0x28   : > { %p1294_p11 = pnand %p1292_p10, %p1280_p9  ;;  %p1299_p13 = scmp.lt.s32.totalorder %s332_s4, %s1297_s3 }
  0x29   : > { %p1300_p0 = scmp.lt.s32.totalorder %s1298_s8, %s1291_s17 }
  0x2a   : > { %p1295_p12 = pneg %p1294_p11 }
  0x2b   : > { %p1301_p1 = por %p1300_p0, %p1299_p13 }
  0x2d   : > { %p1302_p2 = pnand %p1301_p1, %p1295_p12 }
  0x2f   : > { %1305 = shalt.err (!%p1302_p2)
}
  0x30   : > { %s1886_s16 = smov 64   ;;  %s1888_s20 = smov 4  }
  0x31   : > { %1151 = dma.hbm_to_vmem [thread:$0]  (!%p1633_p8), %s330_s7, 512, %s332_s4, %s1637_s22, %s1886_s16, %s1886_s16, %s1888_s20  }
  0x32   : > { %s345_s17 = scalar_lea.vmem [#allocation8], %s1014_s19  ;;  %s1651_s25 = sadd.s32 4294967295, %s1484_s15  }
  0x33   : > { %s352_s24 = sshll.u32 %s345_s17, 4  ;;  %s1007_s26 = sadd.s32 4294967294, %s1484_s15   ;;  %s353_s24 = int_to_ptr.vmem [resolvable:$true] %s352_s24 }
  0x34   : > { %p177_p3 = scmp.ne.s32.totalorder %s1460_s9, %s1456_s30  ;;  %p178_p4 = scmp.eq.s32.totalorder %s1651_s25, 0 }
  0x35   : > { %s244_s2 = sadd.s32 1, %s1452_s29  ;;  %p254_p6 = scmp.ne.s32.totalorder %s1452_s29, %s1448_s28 }
  0x36   : > { %s1661_s3 = scalar_select %p242_p7, %s1452_s29, %s244_s2  }
  0x37   : > { %p1665_p5 = por %p178_p4, %p177_p3  ;;  %p255_p10 = scmp.eq.s32.totalorder %s1651_s25, 5 }
  0x38   : > { %p260_p11 = scmp.ne.s32.totalorder %s1448_s28, %s1444_s27  ;;  %p261_p12 = scmp.eq.s32.totalorder %s1007_s26, 5 }
  0x39   : > { %p1008_p13 = scmp.ge.s32.totalorder %s1484_s15, 1  ;;  %p1675_p0 = por %p255_p10, %p254_p6 }
  0x3a   : > { %p268_p1 = scmp.lt.s32.totalorder %s1484_s15, 7  ;;  %p1680_p2 = por %p261_p12, %p260_p11 }
  0x3b   : > { %s1911_s4 = scalar_select %p1675_p0, 1, 0 }
  0x3c   : > { %s1912_s7 = scalar_select %p1680_p2, 1, 0 }
  0x3d   : > { %p1684_p7 = pnand %p1008_p13, %p268_p1  ;;  %s1489_s23 = smov [#allocation3]  }
  0x3e   : > { %s280_s19 = sshll.u32 %s1489_s23, 4  ;;  %s1061_s17 = sshll.u32 %s1476_s13, 10  ;;  %s1694_s19 = int_to_ptr.vmem [resolvable:$true] %s280_s19 }
  0x3f   : > { %p1144_p3 = pneg %p1684_p7  ;;  %s1914_s6 = sld [smem:[#allocation23_spill]] }
  0x40   : > { %s1319_s5 = scalar_lea.vmem %s353_s24, 1024  ;;  %s1490_s23 = smov [#allocation8]  }
  0x41   : > { %p1698_p6 = pnand %p1144_p3, %p178_p4  ;;  %p1320_p10 = scmp.ne.s32.totalorder %s353_s24, %s1319_s5 }
  0x42   : > { %s1324_s14 = sshll.u32 %s1490_s23, 4  ;;  %s1325_s14 = int_to_ptr.vmem [resolvable:$false] %s1324_s14 }
  0x43   : > { %p1322_p11 = pnand %p1320_p10, %p1280_p9  ;;  %s1326_s13 = scalar_lea.vmem %s1325_s14, 2048 }
  0x44   : > { %p1327_p13 = scmp.lt.s32.totalorder %s353_s24, %s1325_s14  ;;  %p1328_p1 = scmp.lt.s32.totalorder %s1326_s13, %s1319_s5 }
  0x45   : > { %s351_s16 = scalar_lea.hbm %s1914_s6, %s1061_s17  ;;  %p1323_p12 = pneg %p1322_p11 }
  0x46   : > { %p1329_p2 = por %p1328_p1, %p1327_p13 }
  0x48   : > { %p1330_p0 = pnand %p1329_p2, %p1323_p12 }
  0x4a   : > { %1333 = shalt.err (!%p1330_p0)
}
  0x4b   : > { %s1916_s17 = smov 4   ;;  %s1917_s26 = smov 64  }
  0x4c   : > { %1154 = dma.hbm_to_vmem [thread:$0]  (!%p1633_p8), %s351_s16, 1024, %s353_s24, %s1637_s22, %s1917_s26, %s1917_s26, %s1916_s17  }
  0x4d   : > { %p1336_p9 = pneg %p1698_p6  ;;  %s1345_s2 = scalar_lea.vmem %s1694_s19, 256 }
  0x4e   : > { %p1346_p3 = scmp.ne.s32.totalorder %s1694_s19, %s1345_s2  ;;  %p1353_p2 = scmp.lt.s32.totalorder %s1694_s19, %s1694_s19 }
  0x4f   : > { %p1354_p0 = scmp.lt.s32.totalorder %s1345_s2, %s1345_s2 }
  0x50   : > { %p1348_p10 = pnand %p1346_p3, %p1336_p9 }
  0x51   : > { %p1355_p12 = por %p1354_p0, %p1353_p2 }
  0x52   : > { %p1349_p11 = pneg %p1348_p10 }
  0x54   : > { %p1356_p13 = pnand %p1355_p12, %p1349_p11 }
  0x56   : > { %1359 = shalt.err (!%p1356_p13)
}
  0x57   : > { %s1918_s1 = sld [smem:[#allocation18_spill]] }
  0x59   : > { %370 = sbr.rel (%p1684_p7) target bundleno = 756 (0x2f4), region = 52 }
  0x5d   : > { %1147 = dma.hbm_to_vmem [thread:$0]  (!%p1698_p6), %s1918_s1, 256, %s1694_s19, [#allocation4], %s1917_s26, %s1917_s26, %s1916_s17  }
  0x5e   : > { %1431 = dma.done.wait (%p178_p4), [#allocation4], 256  }
  0x5f   : > { %1433 = vsyncadd (%p178_p4), [#allocation4], 4294967040  ;;  %s376_s14 = sand.u32 1, %s1651_s25   ;;  %s378_s18 = sand.u32 1, %s1460_s9  }
  0x60   : > { %s1019_s22 = sshll.u32 %s378_s18, 5  ;;  %s377_s16 = scalar_lea.sflag [#allocation7], %s376_s14 }
  0x61   : > { %s1734_s20 = scalar_lea.vmem [#allocation6], %s1019_s22 }
  0x62   : > { %1435 = dma.done.wait (%p1665_p5), %s377_s16, 1536  }
  0x63   : > { %1437 = vsyncadd (%p1665_p5), %s377_s16, 4294965760  ;;  %s1022_s24 = sshll.u32 %s1472_s12, 1  ;;  %s1020_s30 = sshll.u32 %s378_s18, 6 }
  0x64   : > { %p444_p8 = scmp.lt.s32.totalorder %s1022_s24, 5  ;;  %s1893_s19 = sand.u32 1, %s1448_s28  }
  0x65   : > { %p449_p4 = scmp.lt.s32.totalorder %s1468_s11, 1  ;;  %s1021_s25 = sshll.u32 %s1893_s19, 4 }
  0x66   : > { %s1947_s24 = smov (!%p444_p8, %s1022_s24), 5  ;;  %s1919_s0 = sld [smem:[#allocation17_spill]] }
  0x67   : > { %s1023_s23 = sshll.u32 %s1947_s24, 2  ;;  %s1920_s18 = sld [smem:[#allocation21_spill]] }
  0x68   : > { %s1749_s8 = scalar_select %p449_p4, %s1468_s11, 1 }
  0x69   : > { %s1921_s19 = sld [smem:[#allocation20_spill]]  ;;  %p1026_p5 = scmp.ne.s32.totalorder %s1468_s11, 0 }
  0x6a   : > { %s1062_s5 = sshll.u32 %s1749_s8, 4 }
  0x6c   : > { %s447_s2 = scalar_lea.vmem %s1919_s0, %s1023_s23  ;;  %s1922_s23 = sld [smem:[#allocation24_spill]] }
  0x6d   : > { %v462_v0 = vld [vmem:[%s447_s2] sm:$0xf]  ;;  %v463_v1 = vld [vmem:[%s447_s2 + $0x4] sm:$0xf]  ;;  %s456_s22 = scalar_lea.vmem %s1920_s18, %s1749_s8  ;;  %s1765_s2 = scalar_lea.vmem [#allocation8], %s1020_s30 }
  0x6e   : > { %s1767_s0 = scalar_lea.vmem [#allocation9], %s1021_s25  ;;  %467 = sbr.rel (%p1026_p5) target bundleno = 328 (0x148), region = 68 }
  0x6f   : > { %s1759_s24 = scalar_lea.vmem %s1921_s19, %s1062_s5  ;;  %s1923_s30 = sld [smem:[#allocation19_spill]] (!%p1026_p5) }
  0x72   : > { %s459_s26 = scalar_lea.vmem %s1922_s23, %s1749_s8 }
  0x73   : > { %v1261_v2 = vld [vmem:[#allocation3 + $0x8] sm:$0xff]   ;;  %v1491_v3 = vmov 0.0   ;;  %v1262_v4 = vld [vmem:[#allocation3] sm:$0xff]   ;;  %vm1492_vm0 = vmmov 0   ;;  %v1028_v5 = vcombine.low %v462_v0, %v463_v1  ;;  %vm496_vm1 = vcmask 261120  }
  0x74   : > { %1086 = vmatprep.subr.bf16.mxu0 %v1491_v3  ;;  %1090 = vmatprep.mubr.msk.bf16.mxu0 %vm1492_vm0, %v1491_v3  ;;  %vm551_vm2 = vcmask 519168  }
  0x75   : > { %1087 = vmatpush3.bf16.msra.mxu0 %v1261_v2  ;;  %v1027_v6 = vld [vmem:[%s1923_s30] ss:$0 sm:$0xff] }
  0x76   : > { %1088 = vmatprep.subr.bf16.mxu0 %v1491_v3 }
  0x79   : > { %1089 = vmatpush3.bf16.msra.mxu0 %v1262_v4 }
  0x7c   : > { %1091 = vmatmul.mubr.msk.bf16.vlgmr.msra.gmra.mxu0 %vm496_vm1, %v1028_v5 }
 0x13c   : > { %v534_v7 = vpop.f32.mrf.mxu0 }
 0x13d   : > { %v535_v8 = vadd.f32 %v1027_v6, %v534_v7 }
 0x13e   : > { %v1092_v9 = vpop.f32.mrf.mxu0 }
 0x13f   : > { %v541_v10 = vmax.f32 %v535_v8, 0.0 }
 0x140   : > { %v537_v11 = vpop.f32.mrf.mxu0 }
 0x141   : > { %v1063_v12 = vpack.c.bf16 %v541_v10, %v541_v10  ;;  %v538_v13 = vadd.f32 %v1027_v6, %v537_v11 }
 0x142   : > { %v1093_v14 = vpop.f32.mrf.mxu0 }
 0x143   : > { %552 = vst.msk [vmem:[#allocation2] sm:$0xf] %vm551_vm2, %v1063_v12  ;;  %v542_v15 = vmax.f32 %v538_v13, 0.0 }
 0x145   : > { %v1064_v16 = vpack.c.bf16 %v542_v15, %v542_v15 }
 0x147   : > { %553 = vst.msk [vmem:[#allocation2 + $0x4] sm:$0xf] %vm551_vm2, %v1064_v16 }
 0x148 PF: > { %v1263_v17 = vld [vmem:[%s1759_s24 + $0x8] sm:$0xff]   ;;  %v1493_v18 = vmov 0.0   ;;  %v1264_v19 = vld [vmem:[%s1759_s24] sm:$0xff]   ;;  %vm1494_vm3 = vmmov 0   ;;  %v1265_v20 = vld [vmem:[%s1765_s2 + $0x38] sm:$0xff]   ;;  %v1035_v22 = vcombine.low %v462_v0, %v463_v1  ;;  %vm582_vm4 = vcmask 261120  }
 0x149   : > { %1094 = vmatprep.subr.bf16.mxu0 %v1493_v18  ;;  %1102 = vmatprep.subr.bf16.mxu1 %v1493_v18  ;;  %v1266_v21 = vld [vmem:[%s1765_s2 + $0x30] sm:$0xff]   ;;  %v1268_v23 = vld [vmem:[%s1734_s20 + $0x18] sm:$0xff]   ;;  %v1267_v24 = vld [vmem:[%s1765_s2 + $0x28] sm:$0xff]   ;;  %vm774_vm5 = vcmask 523264   ;;  %s846_s24 = sshll.u32 %s1767_s0, 4  ;;  %s1926_s23 = sld [smem:[#allocation25_spill]]  ;;  %s1809_s24 = int_to_ptr.vmem [resolvable:$true] %s846_s24 }
 0x14a   : > { %1095 = vmatpush3.bf16.msra.mxu0 %v1263_v17  ;;  %1098 = vmatprep.mubr.msk.bf16.mxu0 %vm1494_vm3, %v1493_v18  ;;  %v1269_v25 = vld [vmem:[%s1765_s2 + $0x20] sm:$0xff]   ;;  %v1270_v26 = vld [vmem:[%s1734_s20 + $0x10] sm:$0xff]   ;;  %v1272_v27 = vld [vmem:[%s1734_s20 + $0x8] sm:$0xff]   ;;  %s1927_s8 = sand.u32 1, %s1448_s28   ;;  %p1928_p6 = scmp.ne.s32.totalorder %s1911_s4, 0 }
 0x14b   : > { %1096 = vmatprep.subr.bf16.mxu0 %v1493_v18  ;;  %1118 = vmatprep.mubr.msk.bf16.mxu1 %vm1494_vm3, %v1493_v18  ;;  %v1271_v28 = vld [vmem:[%s1765_s2 + $0x18] sm:$0xff]   ;;  %v1273_v29 = vld [vmem:[%s1765_s2 + $0x10] sm:$0xff]   ;;  %v1274_v30 = vld [vmem:[%s1734_s20] sm:$0xff]   ;;  %s1065_s20 = sshll.u32 %s1472_s12, 2  ;;  %s1495_s1 = smov [#allocation9]  }
 0x14c   : > { %1103 = vmatpush3.bf16.msra.mxu1 %v1265_v20  ;;  %v1275_v31 = vld [vmem:[%s1765_s2 + $0x8] sm:$0xff]   ;;  %v1277_v33 = vld [vmem:[%s1765_s2] sm:$0xff]   ;;  %s843_s13 = sadd.s32 %s1468_s11, %s1065_s20  ;;  %s1360_s2 = scalar_lea.vmem %s1809_s24, 256 }
 0x14d   : > { %1104 = vmatprep.subr.bf16.mxu1 %v1493_v18  ;;  %v1034_v34 = vld [vmem:[%s456_s22] ss:$0 sm:$0xff]  ;;  %s1057_s16 = sshll.u32 %s843_s13, 7  ;;  %p1361_p7 = scmp.ne.s32.totalorder %s1809_s24, %s1360_s2 }
 0x14e   : > { %1097 = vmatpush3.bf16.msra.mxu0 %v1264_v19  ;;  %v1276_v32 = vld [vmem:[#allocation2] sm:$0xff]   ;;  %s1364_s6 = sshll.u32 %s1495_s1, 4  ;;  %s1365_s6 = int_to_ptr.vmem [resolvable:$false] %s1364_s6 }
 0x14f   : > { %1122 = vmatprep.subr.bf16.mxu0 %v1493_v18  ;;  %v1053_v49 = vld [vmem:[%s459_s26] ss:$0 sm:$0xff]  ;;  %s1807_s11 = scalar_lea.hbm %s1926_s23, %s1057_s16  ;;  %s1814_s26 = scalar_lea.sflag [#allocation5], %s1927_s8 }
 0x150   : > { %1105 = vmatpush3.bf16.msra.mxu1 %v1266_v21  ;;  %p1362_p1 = pnand %p1361_p7, %p1928_p6  ;;  %s1366_s30 = scalar_lea.vmem %s1365_s6, 512 }
 0x151   : > { %1099 = vmatmul.mubr.msk.bf16.vlgmr.msra.gmra.mxu0 %vm582_vm4, %v1035_v22  ;;  %1106 = vmatprep.subr.bf16.mxu1 %v1493_v18  ;;  %p1367_p3 = scmp.lt.s32.totalorder %s1809_s24, %s1365_s6  ;;  %p1368_p10 = scmp.lt.s32.totalorder %s1366_s30, %s1360_s2 }
 0x152   : > { %1123 = vmatpush3.bf16.msra.mxu0 %v1268_v23  ;;  %1130 = vmatprep.mubr.msk.bf16.mxu0 %vm1494_vm3, %v1493_v18  ;;  %p1363_p9 = pneg %p1362_p1 }
 0x153   : > { %1124 = vmatprep.subr.bf16.mxu0 %v1493_v18  ;;  %p1369_p11 = por %p1368_p10, %p1367_p3 }
 0x154   : > { %1107 = vmatpush3.bf16.msra.mxu1 %v1267_v24 }
 0x155   : > { %1108 = vmatprep.subr.bf16.mxu1 %v1493_v18  ;;  %p1370_p2 = pnand %p1369_p11, %p1363_p9 }
 0x156   : > { %1125 = vmatpush3.bf16.msra.mxu0 %v1270_v26 }
 0x157   : > { %1126 = vmatprep.subr.bf16.mxu0 %v1493_v18 }
 0x158   : > { %1109 = vmatpush3.bf16.msra.mxu1 %v1269_v25 }
 0x159   : > { %1110 = vmatprep.subr.bf16.mxu1 %v1493_v18 }
 0x15a   : > { %1127 = vmatpush3.bf16.msra.mxu0 %v1272_v27 }
 0x15b   : > { %1128 = vmatprep.subr.bf16.mxu0 %v1493_v18 }
 0x15c   : > { %1111 = vmatpush3.bf16.msra.mxu1 %v1271_v28 }
 0x15d   : > { %1112 = vmatprep.subr.bf16.mxu1 %v1493_v18 }
 0x15e   : > { %1129 = vmatpush3.bf16.msra.mxu0 %v1274_v30 }
 0x160   : > { %1113 = vmatpush3.bf16.msra.mxu1 %v1273_v29 }
 0x161   : > { %1114 = vmatprep.subr.bf16.mxu1 %v1493_v18  ;;  %1131 = vmatmul.mubr.msk.bf16.vlgmr.msra.gmra.mxu0 %vm774_vm5, %v1276_v32 }
 0x164   : > { %1115 = vmatpush3.bf16.msra.mxu1 %v1275_v31 }
 0x165   : > { %1116 = vmatprep.subr.bf16.mxu1 %v1493_v18 }
 0x168   : > { %1117 = vmatpush3.bf16.msra.mxu1 %v1277_v33 }
 0x211   : > { %v620_v35 = vpop.f32.mrf.mxu0 }
 0x212   : > { %v621_v37 = vadd.f32 %v1034_v34, %v620_v35 }
 0x213   : > { %v1100_v36 = vpop.f32.mrf.mxu0 }
 0x214   : > { %v627_v41 = vmax.f32 %v621_v37, 0.0 }
 0x215   : > { %v623_v38 = vpop.f32.mrf.mxu0 }
 0x216   : > { %v624_v39 = vadd.f32 %v1034_v34, %v623_v38 }
 0x217   : > { %v1101_v40 = vpop.f32.mrf.mxu0 }
 0x218   : > { %v628_v42 = vmax.f32 %v624_v39, 0.0 }
 0x21a   : > { %v629_v43 = vpack.c.bf16 %v628_v42, %v627_v41 }
 0x21c   : > { %1119 = vmatmul.mubr.bf16.vlgmr.msra.gmra.mxu1 %v629_v43 }
 0x221   : > { %v812_v44 = vpop.f32.mrf.mxu0 }
 0x223   : > { %v1132_v45 = vpop.f32.mrf.mxu0 }
 0x225   : > { %v815_v46 = vpop.f32.mrf.mxu0 }
 0x227   : > { %v1133_v47 = vpop.f32.mrf.mxu0 }
 0x2dc   : > { %v738_v48 = vpop.f32.mrf.mxu1 }
 0x2dd   : > { %v813_v50 = vadd.f32 %v812_v44, %v738_v48 }
 0x2de   : > { %v1120_v51 = vpop.f32.mrf.mxu1 }
 0x2df   : > { %v826_v52 = vadd.f32 %v1053_v49, %v813_v50 }
 0x2e0   : > { %v741_v53 = vpop.f32.mrf.mxu1 }
 0x2e1   : > { %828 = vst [vmem:[%s1767_s0] sm:$0xff] %v826_v52  ;;  %v816_v54 = vadd.f32 %v815_v46, %v741_v53 }
 0x2e2   : > { %v1121_v55 = vpop.f32.mrf.mxu1 }
 0x2e3   : > { %v827_v56 = vadd.f32 %v1053_v49, %v816_v54 }
 0x2e5   : > { %829 = vst [vmem:[%s1767_s0 + $0x8] sm:$0xff] %v827_v56 }
 0x2e6   : > { %1373 = shalt.err (!%p1370_p2)
}
 0x2e7   : > { %s1374_s0 = scalar_lea.hbm %s1807_s11, 256  ;;  %s1378_s5 = scalar_lea.hbm %s1926_s23, 1536 }
 0x2e8   : > { %p1375_p0 = scmp.ne.s32.totalorder %s1807_s11, %s1374_s0  ;;  %p1379_p8 = scmp.lt.s32.totalorder %s1807_s11, %s1926_s23 }
 0x2e9   : > { %p1380_p4 = scmp.lt.s32.totalorder %s1378_s5, %s1374_s0 }
 0x2ea   : > { %p1376_p12 = pnand %p1375_p0, %p1928_p6 }
 0x2eb   : > { %p1381_p5 = por %p1380_p4, %p1379_p8 }
 0x2ec   : > { %p1377_p13 = pneg %p1376_p12 }
 0x2ee   : > { %p1382_p7 = pnand %p1381_p5, %p1377_p13 }
 0x2f0   : > { %1385 = shalt.err (!%p1382_p7)
}
 0x2f1   : > { %s1496_s14 = smov 128   ;;  %s1497_s18 = smov 256  }
 0x2f2   : > { %s1498_s22 = smov 8  }
 0x2f3   : > { %1142 = dma.vmem_to_hbm [thread:$0]  (%p1928_p6), %s1809_s24, 256, %s1807_s11, %s1814_s26, %s1496_s14, %s1497_s18, %s1498_s22  }
 0x2f4 PF: > { %p1162_p1 = scmp.ge.s32.totalorder %s1484_s15, 2  ;;  %s861_s16 = sand.u32 1, %s1444_s27  }
 0x2f5   : > { %p1929_p9 = scmp.ne.s32.totalorder %s1912_s7, 0  ;;  %s862_s17 = scalar_lea.sflag [#allocation5], %s861_s16 }
 0x2f7   : > { %p1156_p3 = pnand %p1162_p1, %p1929_p9 }
 0x2f9   : > { %p1157_p10 = pneg %p1156_p3 }
 0x2fb   : > { %1439 = dma.done.wait (%p1157_p10), %s862_s17, 256  }
 0x2fc   : > { %1441 = vsyncadd (%p1157_p10), %s862_s17, 4294967040  ;;  %s25_s15 = sadd.s32 1, %s1484_s15   ;;  %s1930_s11 = sld [smem:[#allocation13_spill]] }
 0x2fd   : > { %p22_p11 = scmp.ge.s32.totalorder %s25_s15, 8   ;;  %s1931_s12 = sld [smem:[#allocation14_spill]] }
 0x2fe   : > { %s1932_s13 = sld [smem:[#allocation15_spill]]  ;;  %s1934_s27 = smov %s1448_s28 }
 0x2ff   : > { %s1933_s14 = sld [smem:[#allocation16_spill]]  ;;  %s1935_s28 = smov %s1452_s29 }
 0x300   : > { %s1936_s29 = smov %s1661_s3  ;;  %s1937_s30 = smov %s1460_s9 }
 0x301   : > { %s1938_s9 = smov %s1464_s10  ;;  %s1939_s10 = smov %s1617_s21 }
 0x302   :  { %24 = sbr.rel (!%p22_p11) target bundleno = 20 (0x14), region = 129 }
 0x307   :  { %867 = vsyncpa [#allocation4], 1 }
 0x308   :  { %869 = vsyncpa [#allocation4 + $0x1], 1 }
 0x309   :  { %870 = vsyncpa [#allocation7], 1 }
 0x30a   :  { %872 = vsyncpa [#allocation7 + $0x1], 1 }
 0x30b   :  { %873 = vsyncpa [#allocation5], 1 }
 0x30c   :  { %875 = vsyncpa [#allocation5 + $0x1], 1 }

</bundles_post_ra>
